<compile_context>
chip_gen: v7x
topology: tpu7x:2x2x1
jax: 0.10.0
libtpu: 0.0.40
codegen_flags: <defaults>
</compile_context>

<pallas_src>
import jax
import jax.numpy as jnp
from jax import lax
from jax.experimental import pallas as pl
from jax.experimental.pallas import tpu as pltpu


MAX_TK = 2048   # K-tile cap: (2048, 128) bf16 weight tile is ~0.5 MiB.

_SMALL_NAMES = (
    "be",
    "w0", "b0", "g0", "bt0",
    "w1", "b1", "g1", "bt1",
    "w2", "b2",
    "wp0", "bp0", "gp0", "btp0",
    "wp1", "bp1",
)
_BF16_WEIGHTS = {"w0", "w1", "w2", "wp0", "wp1"}


# ----------------------------- Pallas kernel ------------------------------- #
def _simsiam_kernel(
    # K-tiled inputs
    x1_ref,                # (B, tk)  f32  -- view 1, K-tile (cast in-kernel)
    x2_ref,                # (B, tk)  f32  -- view 2, K-tile
    we_ref,                # (tk, E)  bf16 -- encoder weight, K-tile
    # resident small params (constant block index -> stay in VMEM)
    be_ref,
    w0_ref, b0_ref, g0_ref, bt0_ref,
    w1_ref, b1_ref, g1_ref, bt1_ref,
    w2_ref, b2_ref,
    wp0_ref, bp0_ref, gp0_ref, btp0_ref,
    wp1_ref, bp1_ref,
    # outputs
    loss_ref, z_ref, p_ref,
    # scratch
    acc_ref,               # (2B, E) f32 encoder accumulator
):
    k = pl.program_id(0)
    nk = pl.num_programs(0)
    b = x1_ref.shape[0]

    @pl.when(k == 0)
    def _():
        acc_ref[...] = jnp.zeros_like(acc_ref)

    # K-tiled encoder matmul: f32 -> bf16 cast happens on the VMEM tile,
    # accumulation in f32 on the MXU.  Two M=B dots write disjoint sublane-
    # aligned halves of the accumulator (no in-kernel concat).
    wt = we_ref[...]
    acc_ref[pl.ds(0, b), :] += jnp.dot(
        x1_ref[...].astype(jnp.bfloat16), wt, preferred_element_type=jnp.float32)
    acc_ref[pl.ds(b, b), :] += jnp.dot(
        x2_ref[...].astype(jnp.bfloat16), wt, preferred_element_type=jnp.float32)

    @pl.when(k == nk - 1)
    def _():
        bn_eps = jnp.float32(1e-5)
        cos_eps_sq = jnp.float32(1e-16)   # (1e-8)^2, since we compare squares
        inv_b = jnp.float32(1.0 / b)

        def linear(x, w_ref, bias_ref):
            # bf16 matmul, f32 accumulation, f32 bias add.
            return (jnp.dot(x.astype(w_ref.dtype), w_ref[...],
                            preferred_element_type=jnp.float32)
                    + bias_ref[...])

        def bn_relu(x, g_ref, bt_ref):
            # BatchNorm1d (training mode, biased variance), per view, via a
            # (2, B, D) reshape-and-reduce -- no slices / concatenates.
            d = x.shape[-1]
            xr = x.reshape(2, b, d)
            s = jnp.sum(xr, axis=1, keepdims=True)          # (2, 1, d)
            ss = jnp.sum(xr * xr, axis=1, keepdims=True)
            mu = s * inv_b
            var = ss * inv_b - mu * mu                      # E[x^2] - mu^2
            y = (xr - mu) * lax.rsqrt(var + bn_eps) * g_ref[...] + bt_ref[...]
            return jnp.maximum(y, 0.0).reshape(2 * b, d)

        # encoder stand-in epilogue: bias + ReLU
        h = jnp.maximum(acc_ref[...] + be_ref[...], 0.0)

        # projector: Linear/BN/ReLU, Linear/BN/ReLU, Linear
        h = bn_relu(linear(h, w0_ref, b0_ref), g0_ref, bt0_ref)
        h = bn_relu(linear(h, w1_ref, b1_ref), g1_ref, bt1_ref)
        z = linear(h, w2_ref, b2_ref)

        # predictor: Linear/BN/ReLU, Linear
        hp = bn_relu(linear(z, wp0_ref, bp0_ref), gp0_ref, btp0_ref)
        p = linear(hp, wp1_ref, bp1_ref)

        # cos(p1, z2) and cos(p2, z1) in one pass: rotating z by b rows pairs
        # every p row with the other view's z row (rotation by half the batch
        # is direction-agnostic).  XLU op, off the VALU slot.
        z_sw = pltpu.roll(z, shift=b, axis=0)
        pz = jnp.sum(p * z_sw, axis=-1, keepdims=True)
        pp = jnp.sum(p * p, axis=-1, keepdims=True)
        zz = jnp.sum(z_sw * z_sw, axis=-1, keepdims=True)
        cos = pz * lax.rsqrt(jnp.maximum(pp * zz, cos_eps_sq))

        # mean over all 2B rows == 0.5 * (mean(cos(p1,z2)) + mean(cos(p2,z1)))
        loss_ref[...] = -jnp.mean(cos, keepdims=True)
        z_ref[...] = z
        p_ref[...] = p


# ------------------------------ Host wrapper -------------------------------- #
def _round_up(x, m):
    return (x + m - 1) // m * m


def prepare_params(params, in_dim):
    """One-time host-side prep (call ONCE, outside the jitted forward):
    casts matmul weights to bf16 and K-pads the encoder weight to the tile
    size, so the per-step forward never re-materializes the big weight."""
    tk = min(_round_up(in_dim, 128), MAX_TK)
    k_pad = _round_up(in_dim, tk)
    we = params["we"].astype(jnp.bfloat16)
    if k_pad != in_dim:
        we = jnp.pad(we, ((0, k_pad - in_dim), (0, 0)))
    prep = {"we": we}
    for n in _SMALL_NAMES:
        prep[n] = (params[n].astype(jnp.bfloat16) if n in _BF16_WEIGHTS
                   else params[n].astype(jnp.float32))
    return prep


def simsiam_forward(x1, x2, prep):
    """x1, x2: (B, C, H, W) float32.  `prep` from prepare_params().
    Returns dict matching the PyTorch module."""
    B = x1.shape[0]
    x1f = x1.reshape(B, -1)            # flatten only; cast happens in-kernel
    x2f = x2.reshape(B, -1)
    in_dim = x1f.shape[1]

    we = prep["we"]
    k_pad, enc_dim = we.shape
    tk = min(k_pad, MAX_TK)
    nk = k_pad // tk
    if k_pad != in_dim:
        # Weight rows are already zero-padded; activations must match so the
        # padded-K contribution is exactly 0*0.  (Demo shapes skip this path.)
        pad = k_pad - in_dim
        x1f = jnp.pad(x1f, ((0, 0), (0, pad)))
        x2f = jnp.pad(x2f, ((0, 0), (0, pad)))

    proj_dim = prep["w2"].shape[1]
    pred_dim = prep["wp0"].shape[1]
    small = [prep[n] for n in _SMALL_NAMES]

    # Resident (constant block index) specs: fetched once, stay in VMEM.
    def resident(arr):
        return pl.BlockSpec(arr.shape, lambda k: (0, 0))

    in_specs = [
        pl.BlockSpec((B, tk), lambda k: (0, k)),        # view 1 K-tile (f32)
        pl.BlockSpec((B, tk), lambda k: (0, k)),        # view 2 K-tile (f32)
        pl.BlockSpec((tk, enc_dim), lambda k: (k, 0)),  # encoder weight tile
    ] + [resident(a) for a in small]

    out_specs = (
        pl.BlockSpec((1, 1), lambda k: (0, 0)),             # loss
        pl.BlockSpec((2 * B, proj_dim), lambda k: (0, 0)),  # z (stacked views)
        pl.BlockSpec((2 * B, proj_dim), lambda k: (0, 0)),  # p (stacked views)
    )
    out_shape = (
        jax.ShapeDtypeStruct((1, 1), jnp.float32),
        jax.ShapeDtypeStruct((2 * B, proj_dim), jnp.float32),
        jax.ShapeDtypeStruct((2 * B, proj_dim), jnp.float32),
    )

    # Accurate VMEM budget: double-buffered pipeline blocks (tiled inputs,
    # resident params, outputs) + f32 accumulator + headroom for in-kernel
    # temporaries.  Capped at 64 MiB (v7x physical per-core VMEM).
    resident_bytes = sum(int(a.size) * a.dtype.itemsize for a in small)
    tiled_bytes = 2 * B * tk * 4 + tk * enc_dim * 2
    out_bytes = 4 * (1 + 2 * (2 * B) * proj_dim)
    acc_bytes = 4 * (2 * B) * enc_dim
    footprint = 2 * (tiled_bytes + resident_bytes + out_bytes) + acc_bytes
    vmem_limit = int(min(max(footprint + (4 << 20), 8 << 20), 64 << 20))

    flops = 2 * (2 * B) * (k_pad * enc_dim + enc_dim * proj_dim
                           + 2 * proj_dim * proj_dim + 2 * proj_dim * pred_dim)
    bytes_accessed = (2 * B * k_pad * 4 + k_pad * enc_dim * 2
                      + resident_bytes + out_bytes)

    loss, z, p = pl.pallas_call(
        _simsiam_kernel,
        out_shape=out_shape,
        grid_spec=pltpu.PrefetchScalarGridSpec(
            num_scalar_prefetch=0,
            grid=(nk,),
            in_specs=in_specs,
            out_specs=out_specs,
            scratch_shapes=[pltpu.VMEM((2 * B, enc_dim), jnp.float32)],
        ),
        compiler_params=pltpu.CompilerParams(
            dimension_semantics=("arbitrary",),   # K is a reduction axis
            vmem_limit_bytes=vmem_limit,
        ),
        cost_estimate=pl.CostEstimate(
            flops=int(flops),
            transcendentals=int(12 * B * proj_dim),
            bytes_accessed=int(bytes_accessed),
        ),
    )(x1f, x2f, we, *small)

    return {
        "loss": loss[0, 0],
        "z1": z[:B], "z2": z[B:],
        "p1": p[:B], "p2": p[B:],
    }


# --------------------------- Pure-JAX reference ----------------------------- #
def simsiam_reference(x1, x2, params):
    """Mirrors the kernel numerics (bf16 matmul operands, f32 accumulation)."""
    B = x1.shape[0]

    def mm(a, w):
        return jnp.dot(a.astype(jnp.bfloat16), w.astype(jnp.bfloat16),
                       preferred_element_type=jnp.float32)

    def linear(x, w, b):
        return mm(x, w) + b

    def bn_relu(x, g, bt):
        mu = x.mean(0, keepdims=True)
        var = ((x - mu) ** 2).mean(0, keepdims=True)
        return jnp.maximum((x - mu) / jnp.sqrt(var + 1e-5) * g + bt, 0.0)

    def encode(x):
        return jnp.maximum(linear(x.reshape(B, -1), params["we"], params["be"]), 0.0)

    def project(h):
        h = bn_relu(linear(h, params["w0"], params["b0"]), params["g0"], params["bt0"])
        h = bn_relu(linear(h, params["w1"], params["b1"]), params["g1"], params["bt1"])
        return linear(h, params["w2"], params["b2"])

    def predict(z):
        h = bn_relu(linear(z, params["wp0"], params["bp0"]), params["gp0"], params["btp0"])
        return linear(h, params["wp1"], params["bp1"])

    z1, z2 = project(encode(x1)), project(encode(x2))
    p1, p2 = predict(z1), predict(z2)

    def cos(a, b):
        num = jnp.sum(a * b, -1)
        den = jnp.maximum(jnp.linalg.norm(a, axis=-1) * jnp.linalg.norm(b, axis=-1), 1e-8)
        return num / den

    loss = -(cos(p1, z2).mean() + cos(p2, z1).mean()) * 0.5
    return {"loss": loss, "z1": z1, "z2": z2, "p1": p1, "p2": p2}


def init_params(key, in_dim, encoder_dim, projection_dim, prediction_dim):
    """Deterministic parameter init (shapes match the PyTorch module)."""
    ks = jax.random.split(key, 6)

    def lin(k, din, dout, scale=0.05):
        kw, kb = jax.random.split(k)
        w = jax.random.normal(kw, (din, dout), jnp.float32) * scale
        b = jax.random.normal(kb, (1, dout), jnp.float32) * scale
        return w, b

    p = {}
    # encoder stand-in: Linear(in_dim, encoder_dim) + ReLU
    p["we"], p["be"] = lin(ks[0], in_dim, encoder_dim)
    # projector = ProjectionHead(encoder_dim, projection_dim, projection_dim, 3)
    p["w0"], p["b0"] = lin(ks[1], encoder_dim, projection_dim)
    p["g0"] = jnp.ones((1, projection_dim), jnp.float32)
    p["bt0"] = jnp.zeros((1, projection_dim), jnp.float32)
    p["w1"], p["b1"] = lin(ks[2], projection_dim, projection_dim)
    p["g1"] = jnp.ones((1, projection_dim), jnp.float32)
    p["bt1"] = jnp.zeros((1, projection_dim), jnp.float32)
    p["w2"], p["b2"] = lin(ks[3], projection_dim, projection_dim)
    # predictor = ProjectionHead(projection_dim, prediction_dim, projection_dim, 2)
    p["wp0"], p["bp0"] = lin(ks[4], projection_dim, prediction_dim)
    p["gp0"] = jnp.ones((1, prediction_dim), jnp.float32)
    p["btp0"] = jnp.zeros((1, prediction_dim), jnp.float32)
    p["wp1"], p["bp1"] = lin(ks[5], prediction_dim, projection_dim)
    return p


if __name__ == "__main__":
    # Small, deterministic configuration (lane-dense 128 feature dims).
    B, C, H, W = 8, 3, 16, 16           # in_dim = 768 -> single grid step
    encoder_dim = 128
    projection_dim = 128
    prediction_dim = 128

    key = jax.random.PRNGKey(0)
    k1, k2, kp = jax.random.split(key, 3)

    x1 = jax.random.normal(k1, (B, C, H, W), jnp.float32)
    x2 = jax.random.normal(k2, (B, C, H, W), jnp.float32)
    params = init_params(kp, C * H * W, encoder_dim, projection_dim, prediction_dim)

    # One-time weight prep (cast / pad) outside the per-step forward.
    prep = prepare_params(params, C * H * W)

    out = jax.jit(simsiam_forward)(x1, x2, prep)
    jax.block_until_ready(out)

    ref = simsiam_reference(x1, x2, params)

    assert out["z1"].shape == (B, projection_dim)
    assert out["p2"].shape == (B, projection_dim)
    assert bool(jnp.isfinite(out["loss"]))
    assert bool(jnp.allclose(out["loss"], ref["loss"], atol=5e-2, rtol=5e-2))
    assert bool(jnp.allclose(out["z1"], ref["z1"], atol=5e-2, rtol=5e-2))
    assert bool(jnp.allclose(out["z2"], ref["z2"], atol=5e-2, rtol=5e-2))
    assert bool(jnp.allclose(out["p1"], ref["p1"], atol=5e-2, rtol=5e-2))
    assert bool(jnp.allclose(out["p2"], ref["p2"], atol=5e-2, rtol=5e-2))

    print("KERNEL_OK")
</pallas_src>

<mosaic_0001>
module attributes {stable_mosaic.version = 11 : i64} {
  func.func @_simsiam_kernel(%arg0: i32, %arg1: memref<8x768xf32, #tpu.memory_space<vmem>>, %arg2: memref<8x768xf32, #tpu.memory_space<vmem>>, %arg3: memref<768x128xbf16, #tpu.memory_space<vmem>>, %arg4: memref<1x128xf32, #tpu.memory_space<vmem>>, %arg5: memref<128x128xbf16, #tpu.memory_space<vmem>>, %arg6: memref<1x128xf32, #tpu.memory_space<vmem>>, %arg7: memref<1x128xf32, #tpu.memory_space<vmem>>, %arg8: memref<1x128xf32, #tpu.memory_space<vmem>>, %arg9: memref<128x128xbf16, #tpu.memory_space<vmem>>, %arg10: memref<1x128xf32, #tpu.memory_space<vmem>>, %arg11: memref<1x128xf32, #tpu.memory_space<vmem>>, %arg12: memref<1x128xf32, #tpu.memory_space<vmem>>, %arg13: memref<128x128xbf16, #tpu.memory_space<vmem>>, %arg14: memref<1x128xf32, #tpu.memory_space<vmem>>, %arg15: memref<128x128xbf16, #tpu.memory_space<vmem>>, %arg16: memref<1x128xf32, #tpu.memory_space<vmem>>, %arg17: memref<1x128xf32, #tpu.memory_space<vmem>>, %arg18: memref<1x128xf32, #tpu.memory_space<vmem>>, %arg19: memref<128x128xbf16, #tpu.memory_space<vmem>>, %arg20: memref<1x128xf32, #tpu.memory_space<vmem>>, %arg21: memref<1x1xf32, #tpu.memory_space<vmem>>, %arg22: memref<16x128xf32, #tpu.memory_space<vmem>>, %arg23: memref<16x128xf32, #tpu.memory_space<vmem>>, %arg24: memref<16x128xf32, #tpu.memory_space<vmem>>) attributes {dimension_semantics = [#tpu.dimension_semantics<arbitrary>], iteration_bounds = array<i64: 1>, scalar_prefetch = 0 : i64, scratch_operands = 1 : i64, tpu.core_type = #tpu.core_type<tc>, window_params = [{transform_indices = @transform_0, window_bounds = array<i64: 8, 768>}, {transform_indices = @transform_1, window_bounds = array<i64: 8, 768>}, {transform_indices = @transform_2, window_bounds = array<i64: 768, 128>}, {pipeline_mode = #tpu.pipeline_mode<synchronous>, transform_indices = @transform_3, window_bounds = array<i64: 1, 128>}, {pipeline_mode = #tpu.pipeline_mode<synchronous>, transform_indices = @transform_4, window_bounds = array<i64: 128, 128>}, {pipeline_mode = #tpu.pipeline_mode<synchronous>, transform_indices = @transform_5, window_bounds = array<i64: 1, 128>}, {pipeline_mode = #tpu.pipeline_mode<synchronous>, transform_indices = @transform_6, window_bounds = array<i64: 1, 128>}, {pipeline_mode = #tpu.pipeline_mode<synchronous>, transform_indices = @transform_7, window_bounds = array<i64: 1, 128>}, {pipeline_mode = #tpu.pipeline_mode<synchronous>, transform_indices = @transform_8, window_bounds = array<i64: 128, 128>}, {pipeline_mode = #tpu.pipeline_mode<synchronous>, transform_indices = @transform_9, window_bounds = array<i64: 1, 128>}, {pipeline_mode = #tpu.pipeline_mode<synchronous>, transform_indices = @transform_10, window_bounds = array<i64: 1, 128>}, {pipeline_mode = #tpu.pipeline_mode<synchronous>, transform_indices = @transform_11, window_bounds = array<i64: 1, 128>}, {pipeline_mode = #tpu.pipeline_mode<synchronous>, transform_indices = @transform_12, window_bounds = array<i64: 128, 128>}, {pipeline_mode = #tpu.pipeline_mode<synchronous>, transform_indices = @transform_13, window_bounds = array<i64: 1, 128>}, {pipeline_mode = #tpu.pipeline_mode<synchronous>, transform_indices = @transform_14, window_bounds = array<i64: 128, 128>}, {pipeline_mode = #tpu.pipeline_mode<synchronous>, transform_indices = @transform_15, window_bounds = array<i64: 1, 128>}, {pipeline_mode = #tpu.pipeline_mode<synchronous>, transform_indices = @transform_16, window_bounds = array<i64: 1, 128>}, {pipeline_mode = #tpu.pipeline_mode<synchronous>, transform_indices = @transform_17, window_bounds = array<i64: 1, 128>}, {pipeline_mode = #tpu.pipeline_mode<synchronous>, transform_indices = @transform_18, window_bounds = array<i64: 128, 128>}, {pipeline_mode = #tpu.pipeline_mode<synchronous>, transform_indices = @transform_19, window_bounds = array<i64: 1, 128>}, {pipeline_mode = #tpu.pipeline_mode<synchronous>, transform_indices = @transform_20, window_bounds = array<i64: 1, 1>}, {pipeline_mode = #tpu.pipeline_mode<synchronous>, transform_indices = @transform_21, window_bounds = array<i64: 16, 128>}, {pipeline_mode = #tpu.pipeline_mode<synchronous>, transform_indices = @transform_22, window_bounds = array<i64: 16, 128>}]} {
    %c0_i32 = arith.constant 0 : i32
    %0 = arith.cmpi eq, %arg0, %c0_i32 : i32
    %1 = arith.extui %0 : i1 to i32
    %c0_i32_0 = arith.constant 0 : i32
    %2 = arith.cmpi ne, %1, %c0_i32_0 : i32
    scf.if %2 {
      %cst_16 = arith.constant 0.000000e+00 : f32
      %19 = vector.broadcast %cst_16 : f32 to vector<16x128xf32>
      %c0_17 = arith.constant 0 : index
      %c0_18 = arith.constant 0 : index
      %20 = vector.load %arg24[%c0_17, %c0_18] : memref<16x128xf32, #tpu.memory_space<vmem>>, vector<16x128xf32>
      tpu.vector_store %arg24[%c0_17, %c0_18], %19 {strides = array<i32>} : memref<16x128xf32, #tpu.memory_space<vmem>>, vector<16x128xf32>,
    } else {
    }
    %c0 = arith.constant 0 : index
    %c0_1 = arith.constant 0 : index
    %3 = vector.load %arg3[%c0, %c0_1] : memref<768x128xbf16, #tpu.memory_space<vmem>>, vector<768x128xbf16>
    %c0_2 = arith.constant 0 : index
    %c0_3 = arith.constant 0 : index
    %4 = vector.load %arg24[%c0_2, %c0_3] : memref<16x128xf32, #tpu.memory_space<vmem>>, vector<8x128xf32>
    %c0_4 = arith.constant 0 : index
    %c0_5 = arith.constant 0 : index
    %5 = vector.load %arg1[%c0_4, %c0_5] : memref<8x768xf32, #tpu.memory_space<vmem>>, vector<8x768xf32>
    %6 = arith.truncf %5 : vector<8x768xf32> to vector<8x768xbf16>
    %cst = arith.constant dense<0.000000e+00> : vector<8x128xf32>
    %7 = tpu.matmul %6, %3, %cst {dimension_numbers = #tpu.dot_dimension_numbers<[1], [0], [0], [1], [0, 0, 1, 1], [], []>} : vector<8x768xbf16>, vector<768x128xbf16>, vector<8x128xf32> -> vector<8x128xf32>
    %8 = arith.addf %4, %7 : vector<8x128xf32>
    %c0_6 = arith.constant 0 : index
    %c0_7 = arith.constant 0 : index
    %9 = vector.load %arg24[%c0_6, %c0_7] : memref<16x128xf32, #tpu.memory_space<vmem>>, vector<8x128xf32>
    tpu.vector_store %arg24[%c0_6, %c0_7], %8 {strides = array<i32>} : memref<16x128xf32, #tpu.memory_space<vmem>>, vector<8x128xf32>,
    %c8 = arith.constant 8 : index
    %c0_8 = arith.constant 0 : index
    %10 = vector.load %arg24[%c8, %c0_8] : memref<16x128xf32, #tpu.memory_space<vmem>>, vector<8x128xf32>
    %c0_9 = arith.constant 0 : index
    %c0_10 = arith.constant 0 : index
    %11 = vector.load %arg2[%c0_9, %c0_10] : memref<8x768xf32, #tpu.memory_space<vmem>>, vector<8x768xf32>
    %12 = arith.truncf %11 : vector<8x768xf32> to vector<8x768xbf16>
    %cst_11 = arith.constant dense<0.000000e+00> : vector<8x128xf32>
    %13 = tpu.matmul %12, %3, %cst_11 {dimension_numbers = #tpu.dot_dimension_numbers<[1], [0], [0], [1], [0, 0, 1, 1], [], []>} : vector<8x768xbf16>, vector<768x128xbf16>, vector<8x128xf32> -> vector<8x128xf32>
    %14 = arith.addf %10, %13 : vector<8x128xf32>
    %c8_12 = arith.constant 8 : index
    %c0_13 = arith.constant 0 : index
    %15 = vector.load %arg24[%c8_12, %c0_13] : memref<16x128xf32, #tpu.memory_space<vmem>>, vector<8x128xf32>
    tpu.vector_store %arg24[%c8_12, %c0_13], %14 {strides = array<i32>} : memref<16x128xf32, #tpu.memory_space<vmem>>, vector<8x128xf32>,
    %c0_i32_14 = arith.constant 0 : i32
    %16 = arith.cmpi eq, %arg0, %c0_i32_14 : i32
    %17 = arith.extui %16 : i1 to i32
    %c0_i32_15 = arith.constant 0 : i32
    %18 = arith.cmpi ne, %17, %c0_i32_15 : i32
    scf.if %18 {
      %c0_16 = arith.constant 0 : index
      %c0_17 = arith.constant 0 : index
      %19 = vector.load %arg24[%c0_16, %c0_17] : memref<16x128xf32, #tpu.memory_space<vmem>>, vector<16x128xf32>
      %c0_18 = arith.constant 0 : index
      %c0_19 = arith.constant 0 : index
      %20 = vector.load %arg4[%c0_18, %c0_19] : memref<1x128xf32, #tpu.memory_space<vmem>>, vector<1x128xf32>
      %21 = vector.broadcast %20 : vector<1x128xf32> to vector<16x128xf32>
      %22 = arith.addf %19, %21 : vector<16x128xf32>
      %cst_20 = arith.constant 0.000000e+00 : f32
      %23 = vector.broadcast %cst_20 : f32 to vector<16x128xf32>
      %24 = arith.maximumf %22, %23 : vector<16x128xf32>
      %25 = arith.truncf %24 : vector<16x128xf32> to vector<16x128xbf16>
      %c0_21 = arith.constant 0 : index
      %c0_22 = arith.constant 0 : index
      %26 = vector.load %arg5[%c0_21, %c0_22] : memref<128x128xbf16, #tpu.memory_space<vmem>>, vector<128x128xbf16>
      %cst_23 = arith.constant dense<0.000000e+00> : vector<16x128xf32>
      %27 = tpu.matmul %25, %26, %cst_23 {dimension_numbers = #tpu.dot_dimension_numbers<[1], [0], [0], [1], [0, 0, 1, 1], [], []>} : vector<16x128xbf16>, vector<128x128xbf16>, vector<16x128xf32> -> vector<16x128xf32>
      %c0_24 = arith.constant 0 : index
      %c0_25 = arith.constant 0 : index
      %28 = vector.load %arg6[%c0_24, %c0_25] : memref<1x128xf32, #tpu.memory_space<vmem>>, vector<1x128xf32>
      %29 = vector.broadcast %28 : vector<1x128xf32> to vector<16x128xf32>
      %30 = arith.addf %27, %29 : vector<16x128xf32>
      %31 = vector.shape_cast %30 : vector<16x128xf32> to vector<2x8x128xf32>
      %cst_26 = arith.constant dense<0.000000e+00> : vector<2x128xf32>
      %32 = vector.multi_reduction <add>, %31, %cst_26 [1] : vector<2x8x128xf32> to vector<2x128xf32>
      %33 = vector.shape_cast %32 : vector<2x128xf32> to vector<2x1x128xf32>
      %34 = arith.mulf %31, %31 : vector<2x8x128xf32>
      %cst_27 = arith.constant dense<0.000000e+00> : vector<2x128xf32>
      %35 = vector.multi_reduction <add>, %34, %cst_27 [1] : vector<2x8x128xf32> to vector<2x128xf32>
      %36 = vector.shape_cast %35 : vector<2x128xf32> to vector<2x1x128xf32>
      %cst_28 = arith.constant 1.250000e-01 : f32
      %37 = vector.broadcast %cst_28 : f32 to vector<2x1x128xf32>
      %38 = arith.mulf %33, %37 : vector<2x1x128xf32>
      %cst_29 = arith.constant 1.250000e-01 : f32
      %39 = vector.broadcast %cst_29 : f32 to vector<2x1x128xf32>
      %40 = arith.mulf %36, %39 : vector<2x1x128xf32>
      %41 = arith.mulf %38, %38 : vector<2x1x128xf32>
      %42 = arith.subf %40, %41 : vector<2x1x128xf32>
      %43 = vector.broadcast %38 : vector<2x1x128xf32> to vector<2x8x128xf32>
      %44 = arith.subf %31, %43 : vector<2x8x128xf32>
      %cst_30 = arith.constant 9.99999974E-6 : f32
      %45 = vector.broadcast %cst_30 : f32 to vector<2x1x128xf32>
      %46 = arith.addf %42, %45 : vector<2x1x128xf32>
      %47 = math.rsqrt %46 : vector<2x1x128xf32>
      %48 = vector.broadcast %47 : vector<2x1x128xf32> to vector<2x8x128xf32>
      %49 = arith.mulf %44, %48 : vector<2x8x128xf32>
      %c0_31 = arith.constant 0 : index
      %c0_32 = arith.constant 0 : index
      %50 = vector.load %arg7[%c0_31, %c0_32] : memref<1x128xf32, #tpu.memory_space<vmem>>, vector<1x128xf32>
      %51 = vector.shape_cast %50 : vector<1x128xf32> to vector<1x1x128xf32>
      %52 = vector.broadcast %51 : vector<1x1x128xf32> to vector<2x8x128xf32>
      %53 = arith.mulf %49, %52 : vector<2x8x128xf32>
      %c0_33 = arith.constant 0 : index
      %c0_34 = arith.constant 0 : index
      %54 = vector.load %arg8[%c0_33, %c0_34] : memref<1x128xf32, #tpu.memory_space<vmem>>, vector<1x128xf32>
      %55 = vector.shape_cast %54 : vector<1x128xf32> to vector<1x1x128xf32>
      %56 = vector.broadcast %55 : vector<1x1x128xf32> to vector<2x8x128xf32>
      %57 = arith.addf %53, %56 : vector<2x8x128xf32>
      %cst_35 = arith.constant 0.000000e+00 : f32
      %58 = vector.broadcast %cst_35 : f32 to vector<2x8x128xf32>
      %59 = arith.maximumf %57, %58 : vector<2x8x128xf32>
      %60 = vector.shape_cast %59 : vector<2x8x128xf32> to vector<16x128xf32>
      %61 = arith.truncf %60 : vector<16x128xf32> to vector<16x128xbf16>
      %c0_36 = arith.constant 0 : index
      %c0_37 = arith.constant 0 : index
      %62 = vector.load %arg9[%c0_36, %c0_37] : memref<128x128xbf16, #tpu.memory_space<vmem>>, vector<128x128xbf16>
      %cst_38 = arith.constant dense<0.000000e+00> : vector<16x128xf32>
      %63 = tpu.matmul %61, %62, %cst_38 {dimension_numbers = #tpu.dot_dimension_numbers<[1], [0], [0], [1], [0, 0, 1, 1], [], []>} : vector<16x128xbf16>, vector<128x128xbf16>, vector<16x128xf32> -> vector<16x128xf32>
      %c0_39 = arith.constant 0 : index
      %c0_40 = arith.constant 0 : index
      %64 = vector.load %arg10[%c0_39, %c0_40] : memref<1x128xf32, #tpu.memory_space<vmem>>, vector<1x128xf32>
      %65 = vector.broadcast %64 : vector<1x128xf32> to vector<16x128xf32>
      %66 = arith.addf %63, %65 : vector<16x128xf32>
      %67 = vector.shape_cast %66 : vector<16x128xf32> to vector<2x8x128xf32>
      %cst_41 = arith.constant dense<0.000000e+00> : vector<2x128xf32>
      %68 = vector.multi_reduction <add>, %67, %cst_41 [1] : vector<2x8x128xf32> to vector<2x128xf32>
      %69 = vector.shape_cast %68 : vector<2x128xf32> to vector<2x1x128xf32>
      %70 = arith.mulf %67, %67 : vector<2x8x128xf32>
      %cst_42 = arith.constant dense<0.000000e+00> : vector<2x128xf32>
      %71 = vector.multi_reduction <add>, %70, %cst_42 [1] : vector<2x8x128xf32> to vector<2x128xf32>
      %72 = vector.shape_cast %71 : vector<2x128xf32> to vector<2x1x128xf32>
      %cst_43 = arith.constant 1.250000e-01 : f32
      %73 = vector.broadcast %cst_43 : f32 to vector<2x1x128xf32>
      %74 = arith.mulf %69, %73 : vector<2x1x128xf32>
      %cst_44 = arith.constant 1.250000e-01 : f32
      %75 = vector.broadcast %cst_44 : f32 to vector<2x1x128xf32>
      %76 = arith.mulf %72, %75 : vector<2x1x128xf32>
      %77 = arith.mulf %74, %74 : vector<2x1x128xf32>
      %78 = arith.subf %76, %77 : vector<2x1x128xf32>
      %79 = vector.broadcast %74 : vector<2x1x128xf32> to vector<2x8x128xf32>
      %80 = arith.subf %67, %79 : vector<2x8x128xf32>
      %cst_45 = arith.constant 9.99999974E-6 : f32
      %81 = vector.broadcast %cst_45 : f32 to vector<2x1x128xf32>
      %82 = arith.addf %78, %81 : vector<2x1x128xf32>
      %83 = math.rsqrt %82 : vector<2x1x128xf32>
      %84 = vector.broadcast %83 : vector<2x1x128xf32> to vector<2x8x128xf32>
      %85 = arith.mulf %80, %84 : vector<2x8x128xf32>
      %c0_46 = arith.constant 0 : index
      %c0_47 = arith.constant 0 : index
      %86 = vector.load %arg11[%c0_46, %c0_47] : memref<1x128xf32, #tpu.memory_space<vmem>>, vector<1x128xf32>
      %87 = vector.shape_cast %86 : vector<1x128xf32> to vector<1x1x128xf32>
      %88 = vector.broadcast %87 : vector<1x1x128xf32> to vector<2x8x128xf32>
      %89 = arith.mulf %85, %88 : vector<2x8x128xf32>
      %c0_48 = arith.constant 0 : index
      %c0_49 = arith.constant 0 : index
      %90 = vector.load %arg12[%c0_48, %c0_49] : memref<1x128xf32, #tpu.memory_space<vmem>>, vector<1x128xf32>
      %91 = vector.shape_cast %90 : vector<1x128xf32> to vector<1x1x128xf32>
      %92 = vector.broadcast %91 : vector<1x1x128xf32> to vector<2x8x128xf32>
      %93 = arith.addf %89, %92 : vector<2x8x128xf32>
      %cst_50 = arith.constant 0.000000e+00 : f32
      %94 = vector.broadcast %cst_50 : f32 to vector<2x8x128xf32>
      %95 = arith.maximumf %93, %94 : vector<2x8x128xf32>
      %96 = vector.shape_cast %95 : vector<2x8x128xf32> to vector<16x128xf32>
      %97 = arith.truncf %96 : vector<16x128xf32> to vector<16x128xbf16>
      %c0_51 = arith.constant 0 : index
      %c0_52 = arith.constant 0 : index
      %98 = vector.load %arg13[%c0_51, %c0_52] : memref<128x128xbf16, #tpu.memory_space<vmem>>, vector<128x128xbf16>
      %cst_53 = arith.constant dense<0.000000e+00> : vector<16x128xf32>
      %99 = tpu.matmul %97, %98, %cst_53 {dimension_numbers = #tpu.dot_dimension_numbers<[1], [0], [0], [1], [0, 0, 1, 1], [], []>} : vector<16x128xbf16>, vector<128x128xbf16>, vector<16x128xf32> -> vector<16x128xf32>
      %c0_54 = arith.constant 0 : index
      %c0_55 = arith.constant 0 : index
      %100 = vector.load %arg14[%c0_54, %c0_55] : memref<1x128xf32, #tpu.memory_space<vmem>>, vector<1x128xf32>
      %101 = vector.broadcast %100 : vector<1x128xf32> to vector<16x128xf32>
      %102 = arith.addf %99, %101 : vector<16x128xf32>
      %103 = arith.truncf %102 : vector<16x128xf32> to vector<16x128xbf16>
      %c0_56 = arith.constant 0 : index
      %c0_57 = arith.constant 0 : index
      %104 = vector.load %arg15[%c0_56, %c0_57] : memref<128x128xbf16, #tpu.memory_space<vmem>>, vector<128x128xbf16>
      %cst_58 = arith.constant dense<0.000000e+00> : vector<16x128xf32>
      %105 = tpu.matmul %103, %104, %cst_58 {dimension_numbers = #tpu.dot_dimension_numbers<[1], [0], [0], [1], [0, 0, 1, 1], [], []>} : vector<16x128xbf16>, vector<128x128xbf16>, vector<16x128xf32> -> vector<16x128xf32>
      %c0_59 = arith.constant 0 : index
      %c0_60 = arith.constant 0 : index
      %106 = vector.load %arg16[%c0_59, %c0_60] : memref<1x128xf32, #tpu.memory_space<vmem>>, vector<1x128xf32>
      %107 = vector.broadcast %106 : vector<1x128xf32> to vector<16x128xf32>
      %108 = arith.addf %105, %107 : vector<16x128xf32>
      %109 = vector.shape_cast %108 : vector<16x128xf32> to vector<2x8x128xf32>
      %cst_61 = arith.constant dense<0.000000e+00> : vector<2x128xf32>
      %110 = vector.multi_reduction <add>, %109, %cst_61 [1] : vector<2x8x128xf32> to vector<2x128xf32>
      %111 = vector.shape_cast %110 : vector<2x128xf32> to vector<2x1x128xf32>
      %112 = arith.mulf %109, %109 : vector<2x8x128xf32>
      %cst_62 = arith.constant dense<0.000000e+00> : vector<2x128xf32>
      %113 = vector.multi_reduction <add>, %112, %cst_62 [1] : vector<2x8x128xf32> to vector<2x128xf32>
      %114 = vector.shape_cast %113 : vector<2x128xf32> to vector<2x1x128xf32>
      %cst_63 = arith.constant 1.250000e-01 : f32
      %115 = vector.broadcast %cst_63 : f32 to vector<2x1x128xf32>
      %116 = arith.mulf %111, %115 : vector<2x1x128xf32>
      %cst_64 = arith.constant 1.250000e-01 : f32
      %117 = vector.broadcast %cst_64 : f32 to vector<2x1x128xf32>
      %118 = arith.mulf %114, %117 : vector<2x1x128xf32>
      %119 = arith.mulf %116, %116 : vector<2x1x128xf32>
      %120 = arith.subf %118, %119 : vector<2x1x128xf32>
      %121 = vector.broadcast %116 : vector<2x1x128xf32> to vector<2x8x128xf32>
      %122 = arith.subf %109, %121 : vector<2x8x128xf32>
      %cst_65 = arith.constant 9.99999974E-6 : f32
      %123 = vector.broadcast %cst_65 : f32 to vector<2x1x128xf32>
      %124 = arith.addf %120, %123 : vector<2x1x128xf32>
      %125 = math.rsqrt %124 : vector<2x1x128xf32>
      %126 = vector.broadcast %125 : vector<2x1x128xf32> to vector<2x8x128xf32>
      %127 = arith.mulf %122, %126 : vector<2x8x128xf32>
      %c0_66 = arith.constant 0 : index
      %c0_67 = arith.constant 0 : index
      %128 = vector.load %arg17[%c0_66, %c0_67] : memref<1x128xf32, #tpu.memory_space<vmem>>, vector<1x128xf32>
      %129 = vector.shape_cast %128 : vector<1x128xf32> to vector<1x1x128xf32>
      %130 = vector.broadcast %129 : vector<1x1x128xf32> to vector<2x8x128xf32>
      %131 = arith.mulf %127, %130 : vector<2x8x128xf32>
      %c0_68 = arith.constant 0 : index
      %c0_69 = arith.constant 0 : index
      %132 = vector.load %arg18[%c0_68, %c0_69] : memref<1x128xf32, #tpu.memory_space<vmem>>, vector<1x128xf32>
      %133 = vector.shape_cast %132 : vector<1x128xf32> to vector<1x1x128xf32>
      %134 = vector.broadcast %133 : vector<1x1x128xf32> to vector<2x8x128xf32>
      %135 = arith.addf %131, %134 : vector<2x8x128xf32>
      %cst_70 = arith.constant 0.000000e+00 : f32
      %136 = vector.broadcast %cst_70 : f32 to vector<2x8x128xf32>
      %137 = arith.maximumf %135, %136 : vector<2x8x128xf32>
      %138 = vector.shape_cast %137 : vector<2x8x128xf32> to vector<16x128xf32>
      %139 = arith.truncf %138 : vector<16x128xf32> to vector<16x128xbf16>
      %c0_71 = arith.constant 0 : index
      %c0_72 = arith.constant 0 : index
      %140 = vector.load %arg19[%c0_71, %c0_72] : memref<128x128xbf16, #tpu.memory_space<vmem>>, vector<128x128xbf16>
      %cst_73 = arith.constant dense<0.000000e+00> : vector<16x128xf32>
      %141 = tpu.matmul %139, %140, %cst_73 {dimension_numbers = #tpu.dot_dimension_numbers<[1], [0], [0], [1], [0, 0, 1, 1], [], []>} : vector<16x128xbf16>, vector<128x128xbf16>, vector<16x128xf32> -> vector<16x128xf32>
      %c0_74 = arith.constant 0 : index
      %c0_75 = arith.constant 0 : index
      %142 = vector.load %arg20[%c0_74, %c0_75] : memref<1x128xf32, #tpu.memory_space<vmem>>, vector<1x128xf32>
      %143 = vector.broadcast %142 : vector<1x128xf32> to vector<16x128xf32>
      %144 = arith.addf %141, %143 : vector<16x128xf32>
      %c8_i32 = arith.constant 8 : i32
      %145 = tpu.dynamic_rotate %102 by %c8_i32 dim 0 : vector<16x128xf32>, i32 -> vector<16x128xf32>
      %146 = arith.mulf %144, %145 : vector<16x128xf32>
      %cst_76 = arith.constant dense<0.000000e+00> : vector<16xf32>
      %147 = vector.multi_reduction <add>, %146, %cst_76 [1] : vector<16x128xf32> to vector<16xf32>
      %148 = vector.shape_cast %147 : vector<16xf32> to vector<16x1xf32>
      %149 = arith.mulf %144, %144 : vector<16x128xf32>
      %cst_77 = arith.constant dense<0.000000e+00> : vector<16xf32>
      %150 = vector.multi_reduction <add>, %149, %cst_77 [1] : vector<16x128xf32> to vector<16xf32>
      %151 = vector.shape_cast %150 : vector<16xf32> to vector<16x1xf32>
      %152 = arith.mulf %145, %145 : vector<16x128xf32>
      %cst_78 = arith.constant dense<0.000000e+00> : vector<16xf32>
      %153 = vector.multi_reduction <add>, %152, %cst_78 [1] : vector<16x128xf32> to vector<16xf32>
      %154 = vector.shape_cast %153 : vector<16xf32> to vector<16x1xf32>
      %155 = arith.mulf %151, %154 : vector<16x1xf32>
      %cst_79 = arith.constant 1.000000e-16 : f32
      %156 = vector.broadcast %cst_79 : f32 to vector<16x1xf32>
      %157 = arith.maximumf %155, %156 : vector<16x1xf32>
      %158 = math.rsqrt %157 : vector<16x1xf32>
      %159 = arith.mulf %148, %158 : vector<16x1xf32>
      %160 = vector.shape_cast %159 : vector<16x1xf32> to vector<1x16x1xf32>
      %cst_80 = arith.constant dense<0.000000e+00> : vector<1xf32>
      %161 = vector.multi_reduction <add>, %160, %cst_80 [1, 2] : vector<1x16x1xf32> to vector<1xf32>
      %162 = vector.shape_cast %161 : vector<1xf32> to vector<1x1x1xf32>
      %163 = vector.extract %162[0, 0, 0] : f32 from vector<1x1x1xf32>
      %164 = vector.broadcast %163 : f32 to vector<1x1xf32>
      %cst_81 = arith.constant 1.600000e+01 : f32
      %165 = vector.broadcast %cst_81 : f32 to vector<1x1xf32>
      %166 = arith.divf %164, %165 : vector<1x1xf32>
      %cst_82 = arith.constant 0.000000e+00 : f32
      %167 = vector.broadcast %cst_82 : f32 to vector<1x1xf32>
      %168 = arith.subf %167, %166 : vector<1x1xf32>
      %c0_83 = arith.constant 0 : index
      %c0_84 = arith.constant 0 : index
      %169 = vector.load %arg21[%c0_83, %c0_84] : memref<1x1xf32, #tpu.memory_space<vmem>>, vector<1x1xf32>
      tpu.vector_store %arg21[%c0_83, %c0_84], %168 {strides = array<i32>} : memref<1x1xf32, #tpu.memory_space<vmem>>, vector<1x1xf32>,
      %c0_85 = arith.constant 0 : index
      %c0_86 = arith.constant 0 : index
      %170 = vector.load %arg22[%c0_85, %c0_86] : memref<16x128xf32, #tpu.memory_space<vmem>>, vector<16x128xf32>
      tpu.vector_store %arg22[%c0_85, %c0_86], %102 {strides = array<i32>} : memref<16x128xf32, #tpu.memory_space<vmem>>, vector<16x128xf32>,
      %c0_87 = arith.constant 0 : index
      %c0_88 = arith.constant 0 : index
      %171 = vector.load %arg23[%c0_87, %c0_88] : memref<16x128xf32, #tpu.memory_space<vmem>>, vector<16x128xf32>
      tpu.vector_store %arg23[%c0_87, %c0_88], %144 {strides = array<i32>} : memref<16x128xf32, #tpu.memory_space<vmem>>, vector<16x128xf32>,
    } else {
    }
    return
  }
  func.func @transform_0(%arg0: i32) -> (i32, i32) {
    %c0_i32 = arith.constant 0 : i32
    %c0_i32_0 = arith.constant 0 : i32
    return %c0_i32, %arg0 : i32, i32
  }
  func.func @transform_1(%arg0: i32) -> (i32, i32) {
    %c0_i32 = arith.constant 0 : i32
    %c0_i32_0 = arith.constant 0 : i32
    return %c0_i32, %arg0 : i32, i32
  }
  func.func @transform_2(%arg0: i32) -> (i32, i32) {
    %c0_i32 = arith.constant 0 : i32
    %c0_i32_0 = arith.constant 0 : i32
    return %arg0, %c0_i32 : i32, i32
  }
  func.func @transform_3(%arg0: i32) -> (i32, i32) {
    %c0_i32 = arith.constant 0 : i32
    %c0_i32_0 = arith.constant 0 : i32
    %c0_i32_1 = arith.constant 0 : i32
    return %c0_i32, %c0_i32_0 : i32, i32
  }
  func.func @transform_4(%arg0: i32) -> (i32, i32) {
    %c0_i32 = arith.constant 0 : i32
    %c0_i32_0 = arith.constant 0 : i32
    %c0_i32_1 = arith.constant 0 : i32
    return %c0_i32, %c0_i32_0 : i32, i32
  }
  func.func @transform_5(%arg0: i32) -> (i32, i32) {
    %c0_i32 = arith.constant 0 : i32
    %c0_i32_0 = arith.constant 0 : i32
    %c0_i32_1 = arith.constant 0 : i32
    return %c0_i32, %c0_i32_0 : i32, i32
  }
  func.func @transform_6(%arg0: i32) -> (i32, i32) {
    %c0_i32 = arith.constant 0 : i32
    %c0_i32_0 = arith.constant 0 : i32
    %c0_i32_1 = arith.constant 0 : i32
    return %c0_i32, %c0_i32_0 : i32, i32
  }
  func.func @transform_7(%arg0: i32) -> (i32, i32) {
    %c0_i32 = arith.constant 0 : i32
    %c0_i32_0 = arith.constant 0 : i32
    %c0_i32_1 = arith.constant 0 : i32
    return %c0_i32, %c0_i32_0 : i32, i32
  }
  func.func @transform_8(%arg0: i32) -> (i32, i32) {
    %c0_i32 = arith.constant 0 : i32
    %c0_i32_0 = arith.constant 0 : i32
    %c0_i32_1 = arith.constant 0 : i32
    return %c0_i32, %c0_i32_0 : i32, i32
  }
  func.func @transform_9(%arg0: i32) -> (i32, i32) {
    %c0_i32 = arith.constant 0 : i32
    %c0_i32_0 = arith.constant 0 : i32
    %c0_i32_1 = arith.constant 0 : i32
    return %c0_i32, %c0_i32_0 : i32, i32
  }
  func.func @transform_10(%arg0: i32) -> (i32, i32) {
    %c0_i32 = arith.constant 0 : i32
    %c0_i32_0 = arith.constant 0 : i32
    %c0_i32_1 = arith.constant 0 : i32
    return %c0_i32, %c0_i32_0 : i32, i32
  }
  func.func @transform_11(%arg0: i32) -> (i32, i32) {
    %c0_i32 = arith.constant 0 : i32
    %c0_i32_0 = arith.constant 0 : i32
    %c0_i32_1 = arith.constant 0 : i32
    return %c0_i32, %c0_i32_0 : i32, i32
  }
  func.func @transform_12(%arg0: i32) -> (i32, i32) {
    %c0_i32 = arith.constant 0 : i32
    %c0_i32_0 = arith.constant 0 : i32
    %c0_i32_1 = arith.constant 0 : i32
    return %c0_i32, %c0_i32_0 : i32, i32
  }
  func.func @transform_13(%arg0: i32) -> (i32, i32) {
    %c0_i32 = arith.constant 0 : i32
    %c0_i32_0 = arith.constant 0 : i32
    %c0_i32_1 = arith.constant 0 : i32
    return %c0_i32, %c0_i32_0 : i32, i32
  }
  func.func @transform_14(%arg0: i32) -> (i32, i32) {
    %c0_i32 = arith.constant 0 : i32
    %c0_i32_0 = arith.constant 0 : i32
    %c0_i32_1 = arith.constant 0 : i32
    return %c0_i32, %c0_i32_0 : i32, i32
  }
  func.func @transform_15(%arg0: i32) -> (i32, i32) {
    %c0_i32 = arith.constant 0 : i32
    %c0_i32_0 = arith.constant 0 : i32
    %c0_i32_1 = arith.constant 0 : i32
    return %c0_i32, %c0_i32_0 : i32, i32
  }
  func.func @transform_16(%arg0: i32) -> (i32, i32) {
    %c0_i32 = arith.constant 0 : i32
    %c0_i32_0 = arith.constant 0 : i32
    %c0_i32_1 = arith.constant 0 : i32
    return %c0_i32, %c0_i32_0 : i32, i32
  }
  func.func @transform_17(%arg0: i32) -> (i32, i32) {
    %c0_i32 = arith.constant 0 : i32
    %c0_i32_0 = arith.constant 0 : i32
    %c0_i32_1 = arith.constant 0 : i32
    return %c0_i32, %c0_i32_0 : i32, i32
  }
  func.func @transform_18(%arg0: i32) -> (i32, i32) {
    %c0_i32 = arith.constant 0 : i32
    %c0_i32_0 = arith.constant 0 : i32
    %c0_i32_1 = arith.constant 0 : i32
    return %c0_i32, %c0_i32_0 : i32, i32
  }
  func.func @transform_19(%arg0: i32) -> (i32, i32) {
    %c0_i32 = arith.constant 0 : i32
    %c0_i32_0 = arith.constant 0 : i32
    %c0_i32_1 = arith.constant 0 : i32
    return %c0_i32, %c0_i32_0 : i32, i32
  }
  func.func @transform_20(%arg0: i32) -> (i32, i32) {
    %c0_i32 = arith.constant 0 : i32
    %c0_i32_0 = arith.constant 0 : i32
    %c0_i32_1 = arith.constant 0 : i32
    return %c0_i32, %c0_i32_0 : i32, i32
  }
  func.func @transform_21(%arg0: i32) -> (i32, i32) {
    %c0_i32 = arith.constant 0 : i32
    %c0_i32_0 = arith.constant 0 : i32
    %c0_i32_1 = arith.constant 0 : i32
    return %c0_i32, %c0_i32_0 : i32, i32
  }
  func.func @transform_22(%arg0: i32) -> (i32, i32) {
    %c0_i32 = arith.constant 0 : i32
    %c0_i32_0 = arith.constant 0 : i32
    %c0_i32_1 = arith.constant 0 : i32
    return %c0_i32, %c0_i32_0 : i32, i32
  }
}

</mosaic_0001>

<bundles_post_ra>
// kernel: simsiam_forward.1
= control target key start
LH: loop header
LB: loop body
LE: loop exit
PB: predicated region body
PF: predicated region fallthrough
CT: control target
= control target key end

     0   :  { %s3247_s0 = inlined_call_operand.vmem [shape: f32[8,768], index: 0, kind: input, shape index: {}]   ;;  %s3248_s1 = inlined_call_operand.vmem [shape: f32[8,768], index: 1, kind: input, shape index: {}]   ;;  %s3249_s2 = inlined_call_operand.vmem [shape: bf16[768,128], index: 2, kind: input, shape index: {}]   ;;  %s3250_s3 = inlined_call_operand.vmem [shape: f32[1,128], index: 3, kind: input, shape index: {}]   ;;  %s3251_s4 = inlined_call_operand.vmem [shape: bf16[128,128], index: 4, kind: input, shape index: {}]   ;;  %s3252_s5 = inlined_call_operand.vmem [shape: f32[1,128], index: 5, kind: input, shape index: {}]   ;;  %s3253_s6 = inlined_call_operand.hbm [shape: f32[1,128], index: 6, kind: input, shape index: {}]   ;;  %s3254_s7 = inlined_call_operand.hbm [shape: f32[1,128], index: 7, kind: input, shape index: {}]   ;;  %s3255_s8 = inlined_call_operand.vmem [shape: bf16[128,128], index: 8, kind: input, shape index: {}]   ;;  %s3256_s9 = inlined_call_operand.hbm [shape: f32[1,128], index: 9, kind: input, shape index: {}]   ;;  %s3257_s10 = inlined_call_operand.vmem [shape: f32[1,128], index: 10, kind: input, shape index: {}]   ;;  %s3258_s11 = inlined_call_operand.hbm [shape: f32[1,128], index: 11, kind: input, shape index: {}]   ;;  %s3259_s12 = inlined_call_operand.hbm [shape: bf16[128,128], index: 12, kind: input, shape index: {}]   ;;  %s3260_s13 = inlined_call_operand.hbm [shape: f32[1,128], index: 13, kind: input, shape index: {}]   ;;  %s3261_s14 = inlined_call_operand.hbm [shape: bf16[128,128], index: 14, kind: input, shape index: {}]   ;;  %s3262_s15 = inlined_call_operand.hbm [shape: f32[1,128], index: 15, kind: input, shape index: {}]   ;;  %s3263_s16 = inlined_call_operand.vmem [shape: f32[1,128], index: 16, kind: input, shape index: {}]   ;;  %s3264_s17 = inlined_call_operand.hbm [shape: f32[1,128], index: 17, kind: input, shape index: {}]   ;;  %s3265_s18 = inlined_call_operand.hbm [shape: bf16[128,128], index: 18, kind: input, shape index: {}]   ;;  %s3266_s19 = inlined_call_operand.hbm [shape: f32[1,128], index: 19, kind: input, shape index: {}]   ;;  %s3267_s20 = inlined_call_operand.hbm [shape: f32[1,1], index: 20, kind: output, shape index: {0}]   ;;  %s3268_s21 = inlined_call_operand.vmem [shape: f32[16,128], index: 21, kind: output, shape index: {1}]   ;;  %s3269_s22 = inlined_call_operand.vmem [shape: f32[16,128], index: 22, kind: output, shape index: {2}]  }
   0x1   :  { %3275 = sst [smem:[#allocation29_spill]] %s3247_s0 }
   0x2   :  { %3276 = sst [smem:[#allocation30_spill]] %s3248_s1 }
   0x3   :  { %3277 = sst [smem:[#allocation31_spill]] %s3249_s2 }
   0x4   :  { %3278 = sst [smem:[#allocation32_spill]] %s3250_s3 }
   0x5   :  { %3279 = sst [smem:[#allocation33_spill]] %s3251_s4 }
   0x6   :  { %3280 = sst [smem:[#allocation34_spill]] %s3252_s5 }
   0x7   :  { %3281 = sst [smem:[#allocation35_spill]] %s3253_s6 }
   0x8   :  { %28 = vsyncpa [#allocation4], 0 }
   0x9   :  { %29 = vsyncpa [#allocation7], 0 }
   0xa   :  { %30 = vsyncpa [#allocation10], 0 }
   0xb   :  { %31 = vsyncpa [#allocation13], 0 }
   0xc   :  { %32 = vsyncpa [#allocation16], 0 }
   0xd   :  { %33 = vsyncpa [#allocation19], 0 }
   0xe   :  { %34 = vsyncpa [#allocation5], 0  ;;  %s2484_s3 = smov [#allocation6]   ;;  %s2485_s29 = smov [#allocation9]  }
   0xf   :  { %s63_s28 = sshll.u32 %s2484_s3, 4  ;;  %s87_s30 = sshll.u32 %s2485_s29, 4  ;;  %s64_s28 = int_to_ptr.vmem [resolvable:$true] %s63_s28  ;;  %s88_s30 = int_to_ptr.vmem [resolvable:$true] %s87_s30 }
  0x10   :  { %s2206_s23 = scalar_lea.hbm %s3254_s7, 16 }
  0x11   :  { %p2207_p0 = scmp.ne.s32.totalorder %s3254_s7, %s2206_s23  ;;  %p2210_p1 = scmp.lt.u32.totalorder %s2206_s23, %s3254_s7 }
  0x13   :  { %p2212_p2 = pnand %p2210_p1, %p2207_p0 }
  0x15   :  { %2215 = shalt.err (!%p2212_p2)
}
  0x16   :  { %s2216_s25 = scalar_lea.vmem %s64_s28, 16  ;;  %s2220_s26 = scalar_lea.vmem %s64_s28, 32 }
  0x17   :  { %p2217_p3 = scmp.ne.s32.totalorder %s64_s28, %s2216_s25  ;;  %p2221_p4 = scmp.lt.s32.totalorder %s64_s28, %s64_s28 }
  0x18   :  { %p2222_p5 = scmp.lt.s32.totalorder %s2220_s26, %s2216_s25 }
  0x1a   :  { %p2223_p6 = por %p2222_p5, %p2221_p4 }
  0x1c   :  { %p2224_p7 = pnand %p2223_p6, %p2217_p3 }
  0x1e   :  { %2227 = shalt.err (!%p2224_p7)
}
  0x1f   :  { %66 = dma.hbm_to_vmem [thread:$0]  %s3254_s7, 16, %s64_s28, [#allocation7]  }
  0x20   :  { %s2228_s4 = scalar_lea.hbm %s3258_s11, 16 }
  0x21   :  { %p2229_p8 = scmp.ne.s32.totalorder %s3258_s11, %s2228_s4  ;;  %p2232_p9 = scmp.lt.u32.totalorder %s2228_s4, %s3258_s11 }
  0x23   :  { %p2234_p10 = pnand %p2232_p9, %p2229_p8 }
  0x25   :  { %2237 = shalt.err (!%p2234_p10)
}
  0x26   :  { %s2238_s24 = scalar_lea.vmem %s88_s30, 16  ;;  %s2242_s6 = scalar_lea.vmem %s88_s30, 32 }
  0x27   :  { %p2239_p11 = scmp.ne.s32.totalorder %s88_s30, %s2238_s24  ;;  %p2243_p12 = scmp.lt.s32.totalorder %s88_s30, %s88_s30 }
  0x28   :  { %p2244_p13 = scmp.lt.s32.totalorder %s2242_s6, %s2238_s24 }
  0x2a   :  { %p2245_p0 = por %p2244_p13, %p2243_p12 }
  0x2c   :  { %p2246_p1 = pnand %p2245_p0, %p2239_p11 }
  0x2e   :  { %2249 = shalt.err (!%p2246_p1)
}
  0x2f   :  { %90 = dma.hbm_to_vmem [thread:$0]  %s3258_s11, 16, %s88_s30, [#allocation10]  }
  0x30   :  { %s2486_s25 = smov [#allocation12]   ;;  %s2487_s2 = smov [#allocation15]  }
  0x31   :  { %s109_s26 = sshll.u32 %s2486_s25, 4  ;;  %s131_s27 = sshll.u32 %s2487_s2, 4  ;;  %s110_s26 = int_to_ptr.vmem [resolvable:$true] %s109_s26  ;;  %s132_s27 = int_to_ptr.vmem [resolvable:$true] %s131_s27 }
  0x32   :  { %s2250_s4 = scalar_lea.hbm %s3260_s13, 16 }
  0x33   :  { %p2251_p2 = scmp.ne.s32.totalorder %s3260_s13, %s2250_s4  ;;  %p2254_p3 = scmp.lt.u32.totalorder %s2250_s4, %s3260_s13 }
  0x35   :  { %p2256_p4 = pnand %p2254_p3, %p2251_p2 }
  0x37   :  { %2259 = shalt.err (!%p2256_p4)
}
  0x38   :  { %s2260_s11 = scalar_lea.vmem %s110_s26, 16  ;;  %s2264_s30 = scalar_lea.vmem %s110_s26, 32 }
  0x39   :  { %p2261_p5 = scmp.ne.s32.totalorder %s110_s26, %s2260_s11  ;;  %p2265_p6 = scmp.lt.s32.totalorder %s110_s26, %s110_s26 }
  0x3a   :  { %p2266_p7 = scmp.lt.s32.totalorder %s2264_s30, %s2260_s11 }
  0x3c   :  { %p2267_p8 = por %p2266_p7, %p2265_p6 }
  0x3e   :  { %p2268_p9 = pnand %p2267_p8, %p2261_p5 }
  0x40   :  { %2271 = shalt.err (!%p2268_p9)
}
  0x41   :  { %112 = dma.hbm_to_vmem [thread:$0]  %s3260_s13, 16, %s110_s26, [#allocation13]  }
  0x42   :  { %s2272_s25 = scalar_lea.hbm %s3262_s15, 16 }
  0x43   :  { %p2273_p10 = scmp.ne.s32.totalorder %s3262_s15, %s2272_s25  ;;  %p2276_p11 = scmp.lt.u32.totalorder %s2272_s25, %s3262_s15 }
  0x45   :  { %p2278_p12 = pnand %p2276_p11, %p2273_p10 }
  0x47   :  { %2281 = shalt.err (!%p2278_p12)
}
  0x48   :  { %s2282_s0 = scalar_lea.vmem %s132_s27, 16  ;;  %s2286_s23 = scalar_lea.vmem %s132_s27, 32 }
  0x49   :  { %p2283_p13 = scmp.ne.s32.totalorder %s132_s27, %s2282_s0  ;;  %p2287_p0 = scmp.lt.s32.totalorder %s132_s27, %s132_s27 }
  0x4a   :  { %p2288_p1 = scmp.lt.s32.totalorder %s2286_s23, %s2282_s0 }
  0x4c   :  { %p2289_p2 = por %p2288_p1, %p2287_p0 }
  0x4e   :  { %p2290_p3 = pnand %p2289_p2, %p2283_p13 }
  0x50   :  { %2293 = shalt.err (!%p2290_p3)
}
  0x51   :  { %134 = dma.hbm_to_vmem [thread:$0]  %s3262_s15, 16, %s132_s27, [#allocation16]  }
  0x52   :  { %s2488_s1 = smov [#allocation18]   ;;  %s2489_s11 = smov [#allocation3]  }
  0x53   :  { %s152_s5 = sshll.u32 %s2488_s1, 4  ;;  %s53_s30 = sshll.u32 %s2489_s11, 4  ;;  %s153_s5 = int_to_ptr.vmem [resolvable:$true] %s152_s5  ;;  %s2663_s30 = int_to_ptr.vmem [resolvable:$true] %s53_s30 }
  0x54   :  { %s2294_s7 = scalar_lea.hbm %s3265_s18, 1024 }
  0x55   :  { %p2295_p4 = scmp.ne.s32.totalorder %s3265_s18, %s2294_s7  ;;  %p2298_p5 = scmp.lt.u32.totalorder %s2294_s7, %s3265_s18 }
  0x57   :  { %p2300_p6 = pnand %p2298_p5, %p2295_p4 }
  0x59   :  { %2303 = shalt.err (!%p2300_p6)
}
  0x5a   :  { %s2304_s15 = scalar_lea.vmem %s153_s5, 1024  ;;  %p2309_p8 = scmp.lt.s32.totalorder %s153_s5, %s153_s5 }
  0x5b   :  { %p2305_p7 = scmp.ne.s32.totalorder %s153_s5, %s2304_s15  ;;  %p2310_p9 = scmp.lt.s32.totalorder %s2304_s15, %s2304_s15 }
  0x5d   :  { %p2311_p10 = por %p2310_p9, %p2309_p8 }
  0x5f   :  { %p2312_p11 = pnand %p2311_p10, %p2305_p7 }
  0x61   :  { %2315 = shalt.err (!%p2312_p11)
}
  0x62   :  { %s2490_s27 = smov 64   ;;  %s2491_s29 = smov 4  }
  0x63   :  { %158 = dma.hbm_to_vmem [thread:$0]  %s3265_s18, 1024, %s153_s5, [#allocation19], %s2490_s27, %s2490_s27, %s2491_s29  }
  0x64   :  { %s3282_s26 = sld [smem:[#allocation35_spill]] }
  0x6a   :  { %s2316_s1 = scalar_lea.hbm %s3282_s26, 16 }
  0x6b   :  { %p2317_p12 = scmp.ne.s32.totalorder %s3282_s26, %s2316_s1  ;;  %p2320_p13 = scmp.lt.u32.totalorder %s2316_s1, %s3282_s26 }
  0x6d   :  { %p2322_p0 = pnand %p2320_p13, %p2317_p12 }
  0x6f   :  { %2325 = shalt.err (!%p2322_p0)
}
  0x70   :  { %s2326_s28 = scalar_lea.vmem %s2663_s30, 16  ;;  %s2330_s18 = scalar_lea.vmem %s2663_s30, 32 }
  0x71   :  { %p2327_p1 = scmp.ne.s32.totalorder %s2663_s30, %s2326_s28  ;;  %p2331_p2 = scmp.lt.s32.totalorder %s2663_s30, %s2663_s30 }
  0x72   :  { %p2332_p3 = scmp.lt.s32.totalorder %s2330_s18, %s2326_s28 }
  0x74   :  { %p2333_p4 = por %p2332_p3, %p2331_p2 }
  0x76   :  { %p2334_p5 = pnand %p2333_p4, %p2327_p1 }
  0x78   :  { %2337 = shalt.err (!%p2334_p5)
}
  0x79   :  { %56 = dma.hbm_to_vmem [thread:$0]  %s3282_s26, 16, %s2663_s30, [#allocation4]  }
  0x7a   :  { %s2492_s2 = smov [#allocation8]   ;;  %s2493_s15 = smov [#allocation11]  }
  0x7b   :  { %s75_s3 = sshll.u32 %s2492_s2, 4  ;;  %s96_s4 = sshll.u32 %s2493_s15, 4  ;;  %s76_s3 = int_to_ptr.vmem [resolvable:$true] %s75_s3  ;;  %s2698_s4 = int_to_ptr.vmem [resolvable:$true] %s96_s4 }
  0x7c   :  { %s2338_s13 = scalar_lea.hbm %s3256_s9, 16 }
  0x7d   :  { %p2339_p6 = scmp.ne.s32.totalorder %s3256_s9, %s2338_s13  ;;  %p2342_p7 = scmp.lt.u32.totalorder %s2338_s13, %s3256_s9 }
  0x7f   :  { %p2344_p8 = pnand %p2342_p7, %p2339_p6 }
  0x81   :  { %2347 = shalt.err (!%p2344_p8)
}
  0x82   :  { %s2348_s30 = scalar_lea.vmem %s76_s3, 16  ;;  %s2352_s26 = scalar_lea.vmem %s76_s3, 32 }
  0x83   :  { %p2349_p9 = scmp.ne.s32.totalorder %s76_s3, %s2348_s30  ;;  %p2353_p10 = scmp.lt.s32.totalorder %s76_s3, %s76_s3 }
  0x84   :  { %p2354_p11 = scmp.lt.s32.totalorder %s2352_s26, %s2348_s30 }
  0x86   :  { %p2355_p12 = por %p2354_p11, %p2353_p10 }
  0x88   :  { %p2356_p13 = pnand %p2355_p12, %p2349_p9 }
  0x8a   :  { %2359 = shalt.err (!%p2356_p13)
}
  0x8b   :  { %78 = dma.hbm_to_vmem [thread:$0]  %s3256_s9, 16, %s76_s3, [#allocation7]  }
  0x8c   :  { %s2360_s25 = scalar_lea.hbm %s3259_s12, 1024 }
  0x8d   :  { %p2361_p0 = scmp.ne.s32.totalorder %s3259_s12, %s2360_s25  ;;  %p2364_p1 = scmp.lt.u32.totalorder %s2360_s25, %s3259_s12 }
  0x8f   :  { %p2366_p2 = pnand %p2364_p1, %p2361_p0 }
  0x91   :  { %2369 = shalt.err (!%p2366_p2)
}
  0x92   :  { %s2370_s13 = scalar_lea.vmem %s2698_s4, 1024  ;;  %p2375_p4 = scmp.lt.s32.totalorder %s2698_s4, %s2698_s4 }
  0x93   :  { %p2371_p3 = scmp.ne.s32.totalorder %s2698_s4, %s2370_s13  ;;  %p2376_p5 = scmp.lt.s32.totalorder %s2370_s13, %s2370_s13 }
  0x95   :  { %p2377_p6 = por %p2376_p5, %p2375_p4 }
  0x97   :  { %p2378_p7 = pnand %p2377_p6, %p2371_p3 }
  0x99   :  { %2381 = shalt.err (!%p2378_p7)
}
  0x9a   :  { %102 = dma.hbm_to_vmem [thread:$0]  %s3259_s12, 1024, %s2698_s4, [#allocation10], %s2490_s27, %s2490_s27, %s2491_s29  }
  0x9b   :  { %s2494_s1 = smov [#allocation14]   ;;  %s2495_s24 = smov [#allocation17]  }
  0x9c   :  { %s118_s11 = sshll.u32 %s2494_s1, 4  ;;  %s143_s6 = sshll.u32 %s2495_s24, 4  ;;  %s119_s11 = int_to_ptr.vmem [resolvable:$true] %s118_s11  ;;  %s144_s6 = int_to_ptr.vmem [resolvable:$true] %s143_s6 }
  0x9d   :  { %s2382_s7 = scalar_lea.hbm %s3261_s14, 1024 }
  0x9e   :  { %p2383_p8 = scmp.ne.s32.totalorder %s3261_s14, %s2382_s7  ;;  %p2386_p9 = scmp.lt.u32.totalorder %s2382_s7, %s3261_s14 }
  0xa0   :  { %p2388_p10 = pnand %p2386_p9, %p2383_p8 }
  0xa2   :  { %2391 = shalt.err (!%p2388_p10)
}
  0xa3   :  { %s2392_s12 = scalar_lea.vmem %s119_s11, 1024  ;;  %p2397_p12 = scmp.lt.s32.totalorder %s119_s11, %s119_s11 }
  0xa4   :  { %p2393_p11 = scmp.ne.s32.totalorder %s119_s11, %s2392_s12  ;;  %p2398_p13 = scmp.lt.s32.totalorder %s2392_s12, %s2392_s12 }
  0xa6   :  { %p2399_p0 = por %p2398_p13, %p2397_p12 }
  0xa8   :  { %p2400_p1 = pnand %p2399_p0, %p2393_p11 }
  0xaa   :  { %2403 = shalt.err (!%p2400_p1)
}
  0xab   :  { %124 = dma.hbm_to_vmem [thread:$0]  %s3261_s14, 1024, %s119_s11, [#allocation13], %s2490_s27, %s2490_s27, %s2491_s29  }
  0xac   :  { %s2404_s23 = scalar_lea.hbm %s3264_s17, 16 }
  0xad   :  { %p2405_p2 = scmp.ne.s32.totalorder %s3264_s17, %s2404_s23  ;;  %p2408_p3 = scmp.lt.u32.totalorder %s2404_s23, %s3264_s17 }
  0xaf   :  { %p2410_p4 = pnand %p2408_p3, %p2405_p2 }
  0xb1   :  { %2413 = shalt.err (!%p2410_p4)
}
  0xb2   :  { %s2414_s24 = scalar_lea.vmem %s144_s6, 16  ;;  %s2418_s30 = scalar_lea.vmem %s144_s6, 32 }
  0xb3   :  { %p2415_p5 = scmp.ne.s32.totalorder %s144_s6, %s2414_s24  ;;  %p2419_p6 = scmp.lt.s32.totalorder %s144_s6, %s144_s6 }
  0xb4   :  { %p2420_p7 = scmp.lt.s32.totalorder %s2418_s30, %s2414_s24 }
  0xb6   :  { %p2421_p8 = por %p2420_p7, %p2419_p6 }
  0xb8   :  { %p2422_p9 = pnand %p2421_p8, %p2415_p5 }
  0xba   :  { %2425 = shalt.err (!%p2422_p9)
}
  0xbb   :  { %146 = dma.hbm_to_vmem [thread:$0]  %s3264_s17, 16, %s144_s6, [#allocation16]  }
  0xbc   :  { %s2496_s29 = smov [#allocation20]   ;;  %s2426_s28 = scalar_lea.hbm %s3266_s19, 16 }
  0xbd   :  { %s165_s11 = sshll.u32 %s2496_s29, 4  ;;  %p2427_p10 = scmp.ne.s32.totalorder %s3266_s19, %s2426_s28  ;;  %s166_s11 = int_to_ptr.vmem [resolvable:$true] %s165_s11 }
  0xbe   :  { %p2430_p11 = scmp.lt.u32.totalorder %s2426_s28, %s3266_s19 }
  0xc0   :  { %p2432_p12 = pnand %p2430_p11, %p2427_p10 }
  0xc2   :  { %2435 = shalt.err (!%p2432_p12)
}
  0xc3   :  { %s2436_s4 = scalar_lea.vmem %s166_s11, 16  ;;  %s2440_s17 = scalar_lea.vmem %s166_s11, 32 }
  0xc4   :  { %p2437_p13 = scmp.ne.s32.totalorder %s166_s11, %s2436_s4  ;;  %p2441_p0 = scmp.lt.s32.totalorder %s166_s11, %s166_s11 }
  0xc5   :  { %p2442_p1 = scmp.lt.s32.totalorder %s2440_s17, %s2436_s4 }
  0xc7   :  { %p2443_p2 = por %p2442_p1, %p2441_p0 }
  0xc9   :  { %p2444_p3 = pnand %p2443_p2, %p2437_p13 }
  0xcb   :  { %2447 = shalt.err (!%p2444_p3)
}
  0xcc   :  { %168 = dma.hbm_to_vmem [thread:$0]  %s3266_s19, 16, %s166_s11, [#allocation19]  }
  0xcd   :  { %2470 = dma.done.wait [#allocation4], 16  }
  0xce   :  { %2471 = vsyncadd [#allocation4], 4294967280 }
  0xcf   :  { %2472 = dma.done.wait [#allocation7], 32  }
  0xd0   :  { %2473 = vsyncadd [#allocation7], 4294967264 }
  0xd1   :  { %2474 = dma.done.wait [#allocation10], 1040  }
  0xd2   :  { %2475 = vsyncadd [#allocation10], 4294966256 }
  0xd3   :  { %2476 = dma.done.wait [#allocation13], 1040  }
  0xd4   :  { %2477 = vsyncadd [#allocation13], 4294966256 }
  0xd5   :  { %2478 = dma.done.wait [#allocation16], 32  }
  0xd6   :  { %2479 = vsyncadd [#allocation16], 4294967264 }
  0xd7   :  { %2480 = dma.done.wait [#allocation19], 1040  }
  0xd8   :  { %2481 = vsyncadd [#allocation19], 4294966256  ;;  %s3283_s23 = sld [smem:[#allocation31_spill]]  ;;  %s3284_s25 = sld [smem:[#allocation29_spill]]  ;;  %vm2498_vm0 = vmmov 0   ;;  %vm1656_vm1 = vcmask 7168  }
  0xd9   :  { %s3285_s15 = sld [smem:[#allocation30_spill]]  ;;  %s3286_s3 = sld [smem:[#allocation33_spill]]  ;;  %vm1673_vm2 = vcmask 0  }
  0xda   :  { %s3287_s6 = sld [smem:[#allocation32_spill]]  ;;  %s3288_s28 = sld [smem:[#allocation34_spill]] }
  0xde   :  { %v2774_v0 = vld [vmem:[%s3283_s23 + $0x40] sm:$0xff]   ;;  %v2797_v4 = vld [vmem:[%s3283_s23 + $0x48] sm:$0xff]   ;;  %v2821_v8 = vld [vmem:[%s3283_s23 + $0x50] sm:$0xff]  }
  0xdf   :  { %v2779_v1 = vld [vmem:[%s3283_s23 + $0xc0] sm:$0xff]   ;;  %1807 = vmatprep.subr.bf16.mxu0 %v2774_v0  ;;  %v2803_v5 = vld [vmem:[%s3283_s23 + $0xc8] sm:$0xff]   ;;  %v2827_v9 = vld [vmem:[%s3283_s23 + $0xd0] sm:$0xff]  }
  0xe0   :  { %v2785_v2 = vld [vmem:[%s3283_s23] sm:$0xff]   ;;  %1829 = vmatprep.subr.bf16.mxu1 %v2779_v1  ;;  %v2809_v6 = vld [vmem:[%s3283_s23 + $0x8] sm:$0xff]   ;;  %v2833_v10 = vld [vmem:[%s3283_s23 + $0x10] sm:$0xff]  }
  0xe1   :  { %v2791_v3 = vld [vmem:[%s3283_s23 + $0x80] sm:$0xff]   ;;  %1808 = vmatpush3.bf16.msra.mxu0 %v2785_v2  ;;  %v2815_v7 = vld [vmem:[%s3283_s23 + $0x88] sm:$0xff]   ;;  %v2839_v11 = vld [vmem:[%s3283_s23 + $0x90] sm:$0xff]  }
  0xe2   :  { %1830 = vmatpush3.bf16.msra.mxu1 %v2791_v3  ;;  %1809 = vmatprep.subr.bf16.mxu0 %v2797_v4  ;;  %v2845_v12 = vld [vmem:[%s3283_s23 + $0x58] sm:$0xff]   ;;  %v2869_v16 = vld [vmem:[%s3283_s23 + $0x60] sm:$0xff]   ;;  %v2893_v20 = vld [vmem:[%s3283_s23 + $0x68] sm:$0xff]  }
  0xe3   :  { %1831 = vmatprep.subr.bf16.mxu1 %v2803_v5  ;;  %v2851_v13 = vld [vmem:[%s3283_s23 + $0xd8] sm:$0xff]   ;;  %v2875_v17 = vld [vmem:[%s3283_s23 + $0xe0] sm:$0xff]   ;;  %v2899_v21 = vld [vmem:[%s3283_s23 + $0xe8] sm:$0xff]  }
  0xe4   :  { %v2857_v14 = vld [vmem:[%s3283_s23 + $0x18] sm:$0xff]   ;;  %v2881_v18 = vld [vmem:[%s3283_s23 + $0x20] sm:$0xff]   ;;  %v2905_v22 = vld [vmem:[%s3283_s23 + $0x28] sm:$0xff]  }
  0xe5   :  { %1810 = vmatpush3.bf16.msra.mxu0 %v2809_v6  ;;  %v2863_v15 = vld [vmem:[%s3283_s23 + $0x98] sm:$0xff]   ;;  %v2887_v19 = vld [vmem:[%s3283_s23 + $0xa0] sm:$0xff]   ;;  %v2911_v23 = vld [vmem:[%s3283_s23 + $0xa8] sm:$0xff]  }
  0xe6   :  { %1832 = vmatpush3.bf16.msra.mxu1 %v2815_v7  ;;  %1811 = vmatprep.subr.bf16.mxu0 %v2821_v8  ;;  %v2917_v24 = vld [vmem:[%s3283_s23 + $0x70] sm:$0xff]   ;;  %v2941_v28 = vld [vmem:[%s3283_s23 + $0x78] sm:$0xff]   ;;  %v307_v32 = vld [vmem:[%s3284_s25 + $0x8] sm:$0xff] }
  0xe7   :  { %1833 = vmatprep.subr.bf16.mxu1 %v2827_v9  ;;  %v2923_v25 = vld [vmem:[%s3283_s23 + $0xf0] sm:$0xff]   ;;  %v2947_v29 = vld [vmem:[%s3283_s23 + $0xf8] sm:$0xff]   ;;  %v306_v34 = vld [vmem:[%s3284_s25] sm:$0xff]  ;;  %v313_v35 = vpack.c.bf16 %v307_v32, %v307_v32 }
  0xe8   :  { %v2929_v26 = vld [vmem:[%s3283_s23 + $0x30] sm:$0xff]   ;;  %v2953_v30 = vld [vmem:[%s3283_s23 + $0x38] sm:$0xff]   ;;  %v312_v37 = vpack.c.bf16 %v306_v34, %v306_v34  ;;  %v2978_v40 = vld [vmem:[%s3283_s23 + $0x140] sm:$0xff]  }
  0xe9   :  { %1812 = vmatpush3.bf16.msra.mxu0 %v2833_v10  ;;  %v2935_v27 = vld [vmem:[%s3283_s23 + $0xb0] sm:$0xff]   ;;  %v2959_v31 = vld [vmem:[%s3283_s23 + $0xb8] sm:$0xff]   ;;  %638 = vmatprep.mubr.bf16.mxu0 %v313_v35  ;;  %v2984_v41 = vld [vmem:[%s3283_s23 + $0x100] sm:$0xff]  }
  0xea   :  { %1834 = vmatpush3.bf16.msra.mxu1 %v2839_v11  ;;  %1813 = vmatprep.subr.bf16.mxu0 %v2845_v12  ;;  %v309_v33 = vld [vmem:[%s3284_s25 + $0x18] sm:$0xff]  ;;  %v308_v38 = vld [vmem:[%s3284_s25 + $0x10] sm:$0xff]  ;;  %v2989_v42 = vld [vmem:[%s3283_s23 + $0x148] sm:$0xff]  }
  0xeb   :  { %1835 = vmatprep.subr.bf16.mxu1 %v2851_v13  ;;  %v315_v36 = vpack.c.bf16 %v309_v33, %v309_v33  ;;  %v314_v39 = vpack.c.bf16 %v308_v38, %v308_v38  ;;  %v2998_v43 = vld [vmem:[%s3283_s23 + $0x108] sm:$0xff]   ;;  %v3004_v44 = vld [vmem:[%s3283_s23 + $0x150] sm:$0xff]   ;;  %v2140_v46 = vld [vmem:[%s3283_s23 + $0x158] sm:$0xff]  }
  0xec   :  { %v2139_v45 = vld [vmem:[%s3283_s23 + $0x110] sm:$0xff]   ;;  %v2141_v47 = vld [vmem:[%s3283_s23 + $0x118] sm:$0xff]   ;;  %v2142_v48 = vld [vmem:[%s3283_s23 + $0x160] sm:$0xff]  }
  0xed   :  { %1814 = vmatpush3.bf16.msra.mxu0 %v2857_v14  ;;  %678 = vmatprep.mubr.bf16.mxu1 %v315_v36  ;;  %v311_v49 = vld [vmem:[%s3284_s25 + $0x28] sm:$0xff]  ;;  %v2143_v51 = vld [vmem:[%s3283_s23 + $0x120] sm:$0xff]   ;;  %v2146_v56 = vld [vmem:[%s3283_s23 + $0x170] sm:$0xff]  }
  0xee   :  { %1836 = vmatpush3.bf16.msra.mxu1 %v2863_v15  ;;  %1815 = vmatprep.subr.bf16.mxu0 %v2869_v16  ;;  %v730_v50 = vld [vmem:[%s3285_s15 + $0x8] sm:$0xff]  ;;  %v317_v52 = vpack.c.bf16 %v311_v49, %v311_v49  ;;  %v2147_v57 = vld [vmem:[%s3283_s23 + $0x130] sm:$0xff]   ;;  %v2148_v58 = vld [vmem:[%s3283_s23 + $0x178] sm:$0xff]  }
  0xef   :  { %1837 = vmatprep.subr.bf16.mxu1 %v2875_v17  ;;  %v736_v53 = vpack.c.bf16 %v730_v50, %v730_v50  ;;  %v2144_v54 = vld [vmem:[%s3283_s23 + $0x168] sm:$0xff]   ;;  %v729_v59 = vld [vmem:[%s3285_s15] sm:$0xff]  ;;  %v2149_v60 = vld [vmem:[%s3283_s23 + $0x138] sm:$0xff]  }
  0xf0   :  { %v2145_v55 = vld [vmem:[%s3283_s23 + $0x128] sm:$0xff]   ;;  %v310_v61 = vld [vmem:[%s3284_s25 + $0x20] sm:$0xff]  ;;  %v732_v62 = vld [vmem:[%s3285_s15 + $0x18] sm:$0xff]  ;;  %s2499_s25 = smov [#allocation21]  }
  0xf1   :  { %1816 = vmatpush3.bf16.msra.mxu0 %v2881_v18  ;;  %v734_v63 = vld [vmem:[%s3285_s15 + $0x28] sm:$0xff]  ;;  %s1685_s0 = sshll.u32 %s2499_s25, 4  ;;  %s1686_s0 = int_to_ptr.vmem [resolvable:$true] %s1685_s0 }
  0xf2   :  { %1838 = vmatpush3.bf16.msra.mxu1 %v2887_v19  ;;  %1817 = vmatprep.subr.bf16.mxu0 %v2893_v20  ;;  %s2448_s13 = scalar_lea.vmem %s1686_s0, 16  ;;  %s2452_s9 = scalar_lea.vmem %s1686_s0, 32 }
  0xf3   :  { %1839 = vmatprep.subr.bf16.mxu1 %v2899_v21  ;;  %p2449_p4 = scmp.ne.s32.totalorder %s1686_s0, %s2448_s13  ;;  %p2453_p5 = scmp.lt.s32.totalorder %s1686_s0, %s1686_s0 }
  0xf4   :  { %p2454_p6 = scmp.lt.s32.totalorder %s2452_s9, %s2448_s13 }
  0xf5   :  { %1818 = vmatpush3.bf16.msra.mxu0 %v2905_v22 }
  0xf6   :  { %1840 = vmatpush3.bf16.msra.mxu1 %v2911_v23  ;;  %1819 = vmatprep.subr.bf16.mxu0 %v2917_v24  ;;  %p2455_p7 = por %p2454_p6, %p2453_p5 }
  0xf7   :  { %1841 = vmatprep.subr.bf16.mxu1 %v2923_v25 }
  0xf8   :  { %p2456_p8 = pnand %p2455_p7, %p2449_p4 }
  0xf9   :  { %1820 = vmatpush3.bf16.msra.mxu0 %v2929_v26 }
  0xfa   :  { %1842 = vmatpush3.bf16.msra.mxu1 %v2935_v27  ;;  %1821 = vmatprep.subr.bf16.mxu0 %v2941_v28 }
  0xfb   :  { %1843 = vmatprep.subr.bf16.mxu1 %v2947_v29 }
  0xfd   :  { %1822 = vmatpush3.bf16.msra.mxu0 %v2953_v30 }
  0xfe   :  { %1844 = vmatpush3.bf16.msra.mxu1 %v2959_v31  ;;  %1851 = vmatprep.subr.bf16.mxu0 %v2978_v40 }
  0xff   :  { %1873 = vmatprep.subr.bf16.mxu1 %v2774_v0  ;;  %v735_v0 = vpack.c.bf16 %v729_v59, %v729_v59  ;;  %v2160_v59 = vld [vmem:[%s3255_s8 + $0x10] sm:$0xff]  }
 0x100   :  { %639 = vmatmul.mubr.bf16.vlgmr.msra.gmra.mrb[0].mxu0 %v312_v37 }
 0x101   :  { %679 = vmatmul.mubr.bf16.vlgmr.msra.gmra.mrb[0].mxu1 %v314_v39  ;;  %1852 = vmatpush3.bf16.msra.mxu0 %v2984_v41 }
 0x102   :  { %1874 = vmatpush3.bf16.msra.mxu1 %v2785_v2  ;;  %1853 = vmatprep.subr.bf16.mxu0 %v2989_v42  ;;  %v316_v2 = vpack.c.bf16 %v310_v61, %v310_v61  ;;  %v2162_v61 = vld [vmem:[%s3255_s8 + $0x20] sm:$0xff]  }
 0x103   :  { %1875 = vmatprep.subr.bf16.mxu1 %v2797_v4  ;;  %718 = vmatprep.mubr.bf16.mxu0 %v317_v52  ;;  %v738_v4 = vpack.c.bf16 %v732_v62, %v732_v62  ;;  %v2163_v62 = vld [vmem:[%s3255_s8 + $0x28] sm:$0xff]  }
 0x104   :  { %773 = vmatprep.mubr.bf16.mxu1 %v736_v53 }
 0x105   :  { %1854 = vmatpush3.bf16.msra.mxu0 %v2998_v43 }
 0x106   :  { %1876 = vmatpush3.bf16.msra.mxu1 %v2809_v6  ;;  %1855 = vmatprep.subr.bf16.mxu0 %v3004_v44  ;;  %v740_v6 = vpack.c.bf16 %v734_v63, %v734_v63  ;;  %v2164_v63 = vld [vmem:[%s3255_s8 + $0x30] sm:$0xff]  }
 0x107   :  { %1877 = vmatprep.subr.bf16.mxu1 %v2821_v8  ;;  %v2150_v8 = vld [vmem:[%s3286_s3] sm:$0xff]  }
 0x109   :  { %1856 = vmatpush3.bf16.msra.mxu0 %v2139_v45 }
 0x10a   :  { %1878 = vmatpush3.bf16.msra.mxu1 %v2833_v10  ;;  %1857 = vmatprep.subr.bf16.mxu0 %v2140_v46  ;;  %v2151_v10 = vld [vmem:[%s3286_s3 + $0x8] sm:$0xff]  }
 0x10b   :  { %1879 = vmatprep.subr.bf16.mxu1 %v2845_v12  ;;  %v2153_v12 = vld [vmem:[%s3286_s3 + $0x18] sm:$0xff]  }
 0x10d   :  { %1858 = vmatpush3.bf16.msra.mxu0 %v2141_v47 }
 0x10e   :  { %1880 = vmatpush3.bf16.msra.mxu1 %v2857_v14  ;;  %1859 = vmatprep.subr.bf16.mxu0 %v2142_v48  ;;  %v2155_v14 = vld [vmem:[%s3286_s3 + $0x28] sm:$0xff]  }
 0x10f   :  { %1881 = vmatprep.subr.bf16.mxu1 %v2869_v16  ;;  %v2157_v16 = vld [vmem:[%s3286_s3 + $0x38] sm:$0xff]  }
 0x111   :  { %1860 = vmatpush3.bf16.msra.mxu0 %v2143_v51 }
 0x112   :  { %1882 = vmatpush3.bf16.msra.mxu1 %v2881_v18  ;;  %1861 = vmatprep.subr.bf16.mxu0 %v2144_v54 }
 0x113   :  { %1883 = vmatprep.subr.bf16.mxu1 %v2893_v20 }
 0x115   :  { %1862 = vmatpush3.bf16.msra.mxu0 %v2145_v55 }
 0x116   :  { %1884 = vmatpush3.bf16.msra.mxu1 %v2905_v22  ;;  %1863 = vmatprep.subr.bf16.mxu0 %v2146_v56 }
 0x117   :  { %1885 = vmatprep.subr.bf16.mxu1 %v2917_v24 }
 0x119   :  { %1864 = vmatpush3.bf16.msra.mxu0 %v2147_v57 }
 0x11a   :  { %1886 = vmatpush3.bf16.msra.mxu1 %v2929_v26  ;;  %1865 = vmatprep.subr.bf16.mxu0 %v2148_v58 }
 0x11b   :  { %1887 = vmatprep.subr.bf16.mxu1 %v2941_v28 }
 0x11d   :  { %1866 = vmatpush3.bf16.msra.mxu0 %v2149_v60 }
 0x11e   :  { %1888 = vmatpush3.bf16.msra.mxu1 %v2953_v30  ;;  %1895 = vmatprep.subr.bf16.mxu0 %v2779_v1  ;;  %v733_v1 = vld [vmem:[%s3285_s15 + $0x20] sm:$0xff] }
 0x11f   :  { %1917 = vmatprep.subr.bf16.mxu1 %v2978_v40 }
 0x120   :  { %719 = vmatmul.mubr.bf16.vlgmr.msra.gmra.mrb[4].mxu0 %v316_v2  ;;  %v1756_v2 = vld [vmem:[%s3288_s28] ss:$0 sm:$0xff] }
 0x121   :  { %774 = vmatmul.mubr.bf16.vlgmr.msra.gmra.mrb[4].mxu1 %v735_v0  ;;  %1896 = vmatpush3.bf16.msra.mxu0 %v2791_v3  ;;  %v731_v3 = vld [vmem:[%s3285_s15 + $0x10] sm:$0xff]  ;;  %v2165_v0 = vld [vmem:[%s3255_s8 + $0x38] sm:$0xff]  }
 0x122   :  { %1918 = vmatpush3.bf16.msra.mxu1 %v2984_v41  ;;  %1897 = vmatprep.subr.bf16.mxu0 %v2803_v5  ;;  %v739_v5 = vpack.c.bf16 %v733_v1, %v733_v1 }
 0x123   :  { %1919 = vmatprep.subr.bf16.mxu1 %v2989_v42  ;;  %813 = vmatprep.mubr.bf16.mxu0 %v738_v4 }
 0x124   :  { %853 = vmatprep.mubr.bf16.mxu1 %v740_v6 }
 0x125   :  { %1898 = vmatpush3.bf16.msra.mxu0 %v2815_v7  ;;  %v737_v7 = vpack.c.bf16 %v731_v3, %v731_v3 }
 0x126   :  { %1920 = vmatpush3.bf16.msra.mxu1 %v2998_v43  ;;  %1899 = vmatprep.subr.bf16.mxu0 %v2827_v9  ;;  %v2497_v9 = vmov 0.0  }
 0x127   :  { %1921 = vmatprep.subr.bf16.mxu1 %v3004_v44 }
 0x129   :  { %1900 = vmatpush3.bf16.msra.mxu0 %v2839_v11  ;;  %v2152_v11 = vld [vmem:[%s3286_s3 + $0x10] sm:$0xff]  }
 0x12a   :  { %1922 = vmatpush3.bf16.msra.mxu1 %v2139_v45  ;;  %1901 = vmatprep.subr.bf16.mxu0 %v2851_v13  ;;  %v2154_v13 = vld [vmem:[%s3286_s3 + $0x20] sm:$0xff]  }
 0x12b   :  { %1923 = vmatprep.subr.bf16.mxu1 %v2140_v46 }
 0x12d   :  { %1902 = vmatpush3.bf16.msra.mxu0 %v2863_v15  ;;  %v2156_v15 = vld [vmem:[%s3286_s3 + $0x30] sm:$0xff]  }
 0x12e   :  { %1924 = vmatpush3.bf16.msra.mxu1 %v2141_v47  ;;  %1903 = vmatprep.subr.bf16.mxu0 %v2875_v17 }
 0x12f   :  { %1925 = vmatprep.subr.bf16.mxu1 %v2142_v48  ;;  %v1755_v48 = vld [vmem:[%s3287_s6] ss:$0 sm:$0xff] }
 0x131   :  { %1904 = vmatpush3.bf16.msra.mxu0 %v2887_v19 }
 0x132   :  { %1926 = vmatpush3.bf16.msra.mxu1 %v2143_v51  ;;  %1905 = vmatprep.subr.bf16.mxu0 %v2899_v21 }
 0x133   :  { %1927 = vmatprep.subr.bf16.mxu1 %v2144_v54 }
 0x135   :  { %1906 = vmatpush3.bf16.msra.mxu0 %v2911_v23 }
 0x136   :  { %1928 = vmatpush3.bf16.msra.mxu1 %v2145_v55  ;;  %1907 = vmatprep.subr.bf16.mxu0 %v2923_v25 }
 0x137   :  { %1929 = vmatprep.subr.bf16.mxu1 %v2146_v56 }
 0x139   :  { %1908 = vmatpush3.bf16.msra.mxu0 %v2935_v27 }
 0x13a   :  { %1930 = vmatpush3.bf16.msra.mxu1 %v2147_v57  ;;  %1909 = vmatprep.subr.bf16.mxu0 %v2947_v29  ;;  %v2158_v57 = vld [vmem:[%s3255_s8] sm:$0xff]  }
 0x13b   :  { %1931 = vmatprep.subr.bf16.mxu1 %v2148_v58  ;;  %v2159_v58 = vld [vmem:[%s3255_s8 + $0x8] sm:$0xff]  }
 0x13d   :  { %1910 = vmatpush3.bf16.msra.mxu0 %v2959_v31 }
 0x13e   :  { %1932 = vmatpush3.bf16.msra.mxu1 %v2149_v60  ;;  %1984 = vmatprep.subr.bf16.mxu0 %v2497_v9  ;;  %v2161_v60 = vld [vmem:[%s3255_s8 + $0x18] sm:$0xff]  }
 0x13f   :  { %2004 = vmatprep.subr.bf16.mxu1 %v2497_v9 }
 0x140   :  { %814 = vmatmul.mubr.bf16.vlgmr.msra.gmra.mrb[8].mxu0 %v737_v7 }
 0x141   :  { %854 = vmatmul.mubr.bf16.vlgmr.msra.gmra.mrb[8].mxu1 %v739_v5  ;;  %1985 = vmatpush3.bf16.msra.mxu0 %v2150_v8 }
 0x142   :  { %1986 = vmatprep.subr.bf16.mxu0 %v2497_v9  ;;  %2000 = vmatprep.mubr.msk.bf16.mxu0 %vm2498_vm0, %v2497_v9 }
 0x143   :  { %2020 = vmatprep.mubr.msk.bf16.mxu1 %vm2498_vm0, %v2497_v9  ;;  %2005 = vmatpush3.bf16.msra.mxu1 %v2158_v57 }
 0x144   :  { %2006 = vmatprep.subr.bf16.mxu1 %v2497_v9 }
 0x145   :  { %1987 = vmatpush3.bf16.msra.mxu0 %v2151_v10 }
 0x146   :  { %1988 = vmatprep.subr.bf16.mxu0 %v2497_v9 }
 0x147   :  { %2007 = vmatpush3.bf16.msra.mxu1 %v2159_v58 }
 0x148   :  { %2008 = vmatprep.subr.bf16.mxu1 %v2497_v9 }
 0x149   :  { %1989 = vmatpush3.bf16.msra.mxu0 %v2152_v11 }
 0x14a   :  { %1990 = vmatprep.subr.bf16.mxu0 %v2497_v9 }
 0x14b   :  { %2009 = vmatpush3.bf16.msra.mxu1 %v2160_v59 }
 0x14c   :  { %2010 = vmatprep.subr.bf16.mxu1 %v2497_v9 }
 0x14d   :  { %1991 = vmatpush3.bf16.msra.mxu0 %v2153_v12 }
 0x14e   :  { %1992 = vmatprep.subr.bf16.mxu0 %v2497_v9 }
 0x14f   :  { %2011 = vmatpush3.bf16.msra.mxu1 %v2161_v60  ;;  %v2166_v60 = vld [vmem:[#allocation11] sm:$0xff]  }
 0x150   :  { %2012 = vmatprep.subr.bf16.mxu1 %v2497_v9 }
 0x151   :  { %1993 = vmatpush3.bf16.msra.mxu0 %v2154_v13 }
 0x152   :  { %1994 = vmatprep.subr.bf16.mxu0 %v2497_v9 }
 0x153   :  { %2013 = vmatpush3.bf16.msra.mxu1 %v2162_v61  ;;  %v2167_v61 = vld [vmem:[#allocation11 + $0x8] sm:$0xff]  }
 0x154   :  { %2014 = vmatprep.subr.bf16.mxu1 %v2497_v9 }
 0x155   :  { %1995 = vmatpush3.bf16.msra.mxu0 %v2155_v14 }
 0x156   :  { %1996 = vmatprep.subr.bf16.mxu0 %v2497_v9 }
 0x157   :  { %2015 = vmatpush3.bf16.msra.mxu1 %v2163_v62  ;;  %v2168_v62 = vld [vmem:[#allocation11 + $0x10] sm:$0xff]  }
 0x158   :  { %2016 = vmatprep.subr.bf16.mxu1 %v2497_v9 }
 0x159   :  { %1997 = vmatpush3.bf16.msra.mxu0 %v2156_v15 }
 0x15a   :  { %1998 = vmatprep.subr.bf16.mxu0 %v2497_v9 }
 0x15b   :  { %2017 = vmatpush3.bf16.msra.mxu1 %v2164_v63  ;;  %v2169_v63 = vld [vmem:[#allocation11 + $0x18] sm:$0xff]  }
 0x15c   :  { %2018 = vmatprep.subr.bf16.mxu1 %v2497_v9 }
 0x15d   :  { %1999 = vmatpush3.bf16.msra.mxu0 %v2157_v16 }
 0x15e   :  { %2024 = vmatprep.subr.bf16.mxu0 %v2497_v9 }
 0x15f   :  { %2019 = vmatpush3.bf16.msra.mxu1 %v2165_v0  ;;  %v2170_v0 = vld [vmem:[#allocation11 + $0x20] sm:$0xff]  }
 0x160   :  { %2044 = vmatprep.subr.bf16.mxu1 %v2497_v9 }
 0x1d3   :  { %v1823_v17 = vpop.f32.mrb[0].mxu0 }
 0x1d4   :  { %v1845_v18 = vpop.f32.mrb[0].mxu1  ;;  %v1824_v19 = vpop.f32.mrb[1].mxu0 }
 0x1d5   :  { %v1846_v20 = vpop.f32.mrb[1].mxu1  ;;  %v1825_v21 = vadd.f32 %v1824_v19, %v1823_v17  ;;  %v1826_v23 = vpop.f32.mrb[2].mxu0 }
 0x1d6   :  { %v1847_v22 = vadd.f32 %v1846_v20, %v1845_v18  ;;  %v1848_v24 = vpop.f32.mrb[2].mxu1  ;;  %v1827_v25 = vpop.f32.mrb[3].mxu0 }
 0x1d7   :  { %v1849_v26 = vpop.f32.mrb[3].mxu1 }
 0x1d8   :  { %v681_v27 = vadd.f32 %v1847_v22, %v1825_v21 }
 0x1f3   :  { %v1867_v29 = vpop.f32.mrb[4].mxu0 }
 0x1f4   :  { %v1889_v28 = vpop.f32.mrb[4].mxu1  ;;  %v1868_v31 = vpop.f32.mrb[5].mxu0 }
 0x1f5   :  { %v1890_v30 = vpop.f32.mrb[5].mxu1  ;;  %v1869_v34 = vadd.f32 %v1868_v31, %v1867_v29  ;;  %v1870_v35 = vpop.f32.mrb[6].mxu0 }
 0x1f6   :  { %v1891_v32 = vadd.f32 %v1890_v30, %v1889_v28  ;;  %v1892_v33 = vpop.f32.mrb[6].mxu1  ;;  %v1871_v37 = vpop.f32.mrb[7].mxu0 }
 0x1f7   :  { %v1893_v36 = vpop.f32.mrb[7].mxu1  ;;  %v721_v38 = vadd.f32 %v1869_v34, %v681_v27 }
 0x1f9   :  { %v875_v51 = vadd.f32 %v1755_v48, %v721_v38 }
 0x1fb   :  { %v877_v54 = vmax.f32 %v875_v51, 0.0 }
 0x213   :  { %v1911_v40 = vpop.f32.mrb[8].mxu0 }
 0x214   :  { %v1933_v39 = vpop.f32.mrb[8].mxu1  ;;  %v1912_v42 = vpop.f32.mrb[9].mxu0 }
 0x215   :  { %v1934_v41 = vpop.f32.mrb[9].mxu1  ;;  %v1913_v45 = vadd.f32 %v1912_v42, %v1911_v40  ;;  %v1914_v46 = vpop.f32.mrb[10].mxu0 }
 0x216   :  { %v1935_v43 = vadd.f32 %v1934_v41, %v1933_v39  ;;  %v1936_v44 = vpop.f32.mrb[10].mxu1  ;;  %v1915_v49 = vpop.f32.mrb[11].mxu0 }
 0x217   :  { %v1937_v47 = vpop.f32.mrb[11].mxu1  ;;  %v816_v50 = vadd.f32 %v1913_v45, %v1891_v32 }
 0x218   :  { %v1765_v47 = vld [vmem:[#allocation3] ss:$0 sm:$0xff] }
 0x219   :  { %v856_v52 = vadd.f32 %v1935_v43, %v816_v50 }
 0x21b   :  { %v876_v53 = vadd.f32 %v1755_v48, %v856_v52  ;;  %v1766_v52 = vld [vmem:[#allocation6] ss:$0 sm:$0xff] }
 0x21d   :  { %v878_v55 = vmax.f32 %v876_v53, 0.0 }
 0x21f   :  { %v879_v56 = vpack.c.bf16 %v878_v55, %v877_v54 }
 0x221   :  { %2001 = vmatmul.mubr.bf16.vlgmr.msra.gmra.mrb[12].mxu0 %v879_v56 }
 0x222   :  { %2040 = vmatprep.mubr.msk.bf16.mxu0 %vm2498_vm0, %v2497_v9  ;;  %2025 = vmatpush3.bf16.msra.mxu0 %v2166_v60 }
 0x223   :  { %2026 = vmatprep.subr.bf16.mxu0 %v2497_v9 }
 0x226   :  { %2027 = vmatpush3.bf16.msra.mxu0 %v2167_v61  ;;  %v1777_v61 = vld [vmem:[#allocation9] ss:$0 sm:$0xff] }
 0x227   :  { %2028 = vmatprep.subr.bf16.mxu0 %v2497_v9 }
 0x22a   :  { %2029 = vmatpush3.bf16.msra.mxu0 %v2168_v62 }
 0x22b   :  { %2030 = vmatprep.subr.bf16.mxu0 %v2497_v9 }
 0x22e   :  { %2031 = vmatpush3.bf16.msra.mxu0 %v2169_v63 }
 0x22f   :  { %2032 = vmatprep.subr.bf16.mxu0 %v2497_v9 }
 0x232   :  { %2033 = vmatpush3.bf16.msra.mxu0 %v2170_v0 }
 0x233   :  { %2034 = vmatprep.subr.bf16.mxu0 %v2497_v9 }
 0x2f4   :  { %v985_v4 = vpop.f32.mrb[12].mxu0 }
 0x2f5   :  { %v986_v6 = vadd.f32 %v1756_v2, %v985_v4  ;;  %v2002_v1 = vpop.f32.mrb[13].mxu0  ;;  %v2172_v4 = vld [vmem:[#allocation11 + $0x30] sm:$0xff]  }
 0x2f6   :  { %v988_v3 = vpop.f32.mrb[14].mxu0  ;;  %v2174_v1 = vld [vmem:[#allocation14] sm:$0xff]  }
 0x2f7   :  { %v992_v5 = vrot.slane %v986_v6, 4  ;;  %v1004_v7 = vmul.f32 %v986_v6, %v986_v6  ;;  %v989_v8 = vadd.f32 %v1756_v2, %v988_v3  ;;  %v2003_v10 = vpop.f32.mrb[15].mxu0  ;;  %v2171_v2 = vld [vmem:[#allocation11 + $0x28] sm:$0xff]  }
 0x2f8   :  { %2035 = vmatpush3.bf16.msra.mxu0 %v2171_v2  ;;  %v2175_v3 = vld [vmem:[#allocation14 + $0x8] sm:$0xff]  }
 0x2f9   :  { %v993_v11 = vadd.f32 %v992_v5, %v986_v6  ;;  %v1006_v12 = vrot.slane %v1004_v7, 4  ;;  %v998_v13 = vrot.slane %v989_v8, 4  ;;  %v1005_v14 = vmul.f32 %v989_v8, %v989_v8  ;;  %2036 = vmatprep.subr.bf16.mxu0 %v2497_v9  ;;  %v2176_v5 = vld [vmem:[#allocation14 + $0x10] sm:$0xff]   ;;  %v2179_v10 = vld [vmem:[#allocation14 + $0x28] sm:$0xff]  }
 0x2fb   :  { %v994_v15 = vrot.slane %v993_v11, 2  ;;  %v1007_v16 = vadd.f32 %v1006_v12, %v1004_v7  ;;  %v999_v17 = vadd.f32 %v998_v13, %v989_v8  ;;  %v1012_v18 = vrot.slane %v1005_v14, 4  ;;  %v2177_v7 = vld [vmem:[#allocation14 + $0x18] sm:$0xff]  }
 0x2fc   :  { %2037 = vmatpush3.bf16.msra.mxu0 %v2172_v4 }
 0x2fd   :  { %v995_v19 = vadd.f32 %v994_v15, %v993_v11  ;;  %v1008_v20 = vrot.slane %v1007_v16, 2  ;;  %v1000_v21 = vrot.slane %v999_v17, 2  ;;  %v1013_v22 = vadd.f32 %v1012_v18, %v1005_v14  ;;  %2038 = vmatprep.subr.bf16.mxu0 %v2497_v9  ;;  %v1767_v11 = vld [vmem:[#allocation8] ss:$0 sm:$0xff] }
 0x2ff   :  { %v996_v23 = vrot.slane %v995_v19, 1  ;;  %v1009_v24 = vadd.f32 %v1008_v20, %v1007_v16  ;;  %v1001_v25 = vadd.f32 %v1000_v21, %v999_v17  ;;  %v1014_v26 = vrot.slane %v1013_v22, 2 }
 0x301   :  { %v997_v27 = vadd.f32 %v996_v23, %v995_v19  ;;  %v1010_v28 = vrot.slane %v1009_v24, 1  ;;  %v1002_v29 = vrot.slane %v1001_v25, 1  ;;  %v1015_v30 = vadd.f32 %v1014_v26, %v1013_v22 }
 0x303   :  { %v1011_v31 = vadd.f32 %v1010_v28, %v1009_v24  ;;  %v1018_v32 = vmul.f32 0.125, %v997_v27  ;;  %v1003_v33 = vadd.f32 %v1002_v29, %v1001_v25  ;;  %v1016_v34 = vrot.slane %v1015_v30, 1 }
 0x305   :  { %v1020_v35 = vmul.f32 0.125, %v1011_v31  ;;  %v1022_v36 = vmul.f32 %v1018_v32, %v1018_v32  ;;  %v1017_v37 = vadd.f32 %v1016_v34, %v1015_v30  ;;  %v1019_v38 = vmul.f32 0.125, %v1003_v33 }
 0x306   :  { %v1026_v45 = vsub.f32 %v986_v6, %v1018_v32  ;;  %v2173_v6 = vld [vmem:[#allocation11 + $0x38] sm:$0xff]  }
 0x307   :  { %v1024_v39 = vsub.f32 %v1020_v35, %v1022_v36  ;;  %v1021_v40 = vmul.f32 0.125, %v1017_v37  ;;  %v1023_v41 = vmul.f32 %v1019_v38, %v1019_v38  ;;  %v1027_v49 = vsub.f32 %v989_v8, %v1019_v38  ;;  %2039 = vmatpush3.bf16.msra.mxu0 %v2173_v6  ;;  %v2178_v8 = vld [vmem:[#allocation14 + $0x20] sm:$0xff]  }
 0x308   :  { %2064 = vmatprep.subr.bf16.mxu0 %v2497_v9 }
 0x309   :  { %v1028_v42 = vadd.f32 1e-05, %v1024_v39  ;;  %v1025_v43 = vsub.f32 %v1021_v40, %v1023_v41 }
 0x30b   :  { %2190 = vrsqrt.f32 %v1028_v42  ;;  %v1029_v44 = vadd.f32 1e-05, %v1025_v43 }
 0x30d   :  { %2192 = vrsqrt.f32 %v1029_v44 }
 0x315   :  { %v2191_v46 = vpop.eup %2190 }
 0x316   :  { %v1032_v48 = vmul.f32 %v2191_v46, %v1026_v45 }
 0x317   :  { %v2193_v50 = vpop.eup %2192 }
 0x318   :  { %v1041_v51 = vmul.f32 %v1765_v47, %v1032_v48  ;;  %v1033_v53 = vmul.f32 %v2193_v50, %v1027_v49 }
 0x31a   :  { %v1042_v54 = vmul.f32 %v1765_v47, %v1033_v53  ;;  %v1050_v55 = vadd.f32 %v1766_v52, %v1041_v51 }
 0x31c   :  { %v1051_v56 = vadd.f32 %v1766_v52, %v1042_v54  ;;  %v1052_v57 = vmax.f32 %v1050_v55, 0.0 }
 0x31e   :  { %v1053_v58 = vmax.f32 %v1051_v56, 0.0  ;;  %v1776_v56 = vld [vmem:[%s3257_s10] ss:$0 sm:$0xff] }
 0x320   :  { %v1054_v59 = vpack.c.bf16 %v1053_v58, %v1052_v57 }
 0x322   :  { %2021 = vmatmul.mubr.bf16.vlgmr.msra.gmra.mrb[12].mxu1 %v1054_v59 }
 0x323   :  { %2060 = vmatprep.mubr.msk.bf16.mxu1 %vm2498_vm0, %v2497_v9  ;;  %2045 = vmatpush3.bf16.msra.mxu1 %v2174_v1 }
 0x324   :  { %2046 = vmatprep.subr.bf16.mxu1 %v2497_v9 }
 0x327   :  { %2047 = vmatpush3.bf16.msra.mxu1 %v2175_v3  ;;  %v2180_v3 = vld [vmem:[#allocation14 + $0x30] sm:$0xff]  }
 0x328   :  { %2048 = vmatprep.subr.bf16.mxu1 %v2497_v9 }
 0x32b   :  { %2049 = vmatpush3.bf16.msra.mxu1 %v2176_v5  ;;  %v2181_v5 = vld [vmem:[#allocation14 + $0x38] sm:$0xff]  }
 0x32c   :  { %2050 = vmatprep.subr.bf16.mxu1 %v2497_v9 }
 0x32f   :  { %2051 = vmatpush3.bf16.msra.mxu1 %v2177_v7  ;;  %v1778_v7 = vld [vmem:[#allocation12] ss:$0 sm:$0xff] }
 0x330   :  { %2052 = vmatprep.subr.bf16.mxu1 %v2497_v9 }
 0x333   :  { %2053 = vmatpush3.bf16.msra.mxu1 %v2178_v8 }
 0x334   :  { %2054 = vmatprep.subr.bf16.mxu1 %v2497_v9 }
 0x337   :  { %2055 = vmatpush3.bf16.msra.mxu1 %v2179_v10 }
 0x338   :  { %2056 = vmatprep.subr.bf16.mxu1 %v2497_v9 }
 0x33b   :  { %2057 = vmatpush3.bf16.msra.mxu1 %v2180_v3 }
 0x33c   :  { %2058 = vmatprep.subr.bf16.mxu1 %v2497_v9 }
 0x33f   :  { %2059 = vmatpush3.bf16.msra.mxu1 %v2181_v5  ;;  %v1796_v5 = vld [vmem:[%s3263_s16] ss:$0 sm:$0xff] }
 0x3f5   :  { %v1160_v12 = vpop.f32.mrb[12].mxu1 }
 0x3f6   :  { %v1161_v13 = vadd.f32 %v1767_v11, %v1160_v12  ;;  %v2022_v14 = vpop.f32.mrb[13].mxu1 }
 0x3f7   :  { %v1163_v15 = vpop.f32.mrb[14].mxu1 }
 0x3f8   :  { %v1167_v16 = vrot.slane %v1161_v13, 4  ;;  %v1179_v17 = vmul.f32 %v1161_v13, %v1161_v13  ;;  %v1164_v18 = vadd.f32 %v1767_v11, %v1163_v15  ;;  %v2023_v19 = vpop.f32.mrb[15].mxu1 }
 0x3f9   :  { %v2183_v19 = vld [vmem:[#allocation18 + $0x8] sm:$0xff]  }
 0x3fa   :  { %v1168_v20 = vadd.f32 %v1167_v16, %v1161_v13  ;;  %v1181_v21 = vrot.slane %v1179_v17, 4  ;;  %v1173_v22 = vrot.slane %v1164_v18, 4  ;;  %v1180_v23 = vmul.f32 %v1164_v18, %v1164_v18 }
 0x3fc   :  { %v1169_v24 = vrot.slane %v1168_v20, 2  ;;  %v1182_v25 = vadd.f32 %v1181_v21, %v1179_v17  ;;  %v1174_v26 = vadd.f32 %v1173_v22, %v1164_v18  ;;  %v1187_v27 = vrot.slane %v1180_v23, 4  ;;  %v2185_v21 = vld [vmem:[#allocation18 + $0x18] sm:$0xff]   ;;  %v2186_v22 = vld [vmem:[#allocation18 + $0x20] sm:$0xff]  }
 0x3fe   :  { %v1170_v28 = vadd.f32 %v1169_v24, %v1168_v20  ;;  %v1183_v29 = vrot.slane %v1182_v25, 2  ;;  %v1175_v30 = vrot.slane %v1174_v26, 2  ;;  %v1188_v31 = vadd.f32 %v1187_v27, %v1180_v23  ;;  %v2184_v20 = vld [vmem:[#allocation18 + $0x10] sm:$0xff]   ;;  %v2187_v23 = vld [vmem:[#allocation18 + $0x28] sm:$0xff]  }
 0x3ff   :  { %v2188_v24 = vld [vmem:[#allocation18 + $0x30] sm:$0xff]  }
 0x400   :  { %v1171_v32 = vrot.slane %v1170_v28, 1  ;;  %v1184_v33 = vadd.f32 %v1183_v29, %v1182_v25  ;;  %v1176_v34 = vadd.f32 %v1175_v30, %v1174_v26  ;;  %v1189_v35 = vrot.slane %v1188_v31, 2  ;;  %v2189_v25 = vld [vmem:[#allocation18 + $0x38] sm:$0xff]  }
 0x401   :  { %v1787_v26 = vld [vmem:[#allocation15] ss:$0 sm:$0xff] }
 0x402   :  { %v1172_v36 = vadd.f32 %v1171_v32, %v1170_v28  ;;  %v1185_v37 = vrot.slane %v1184_v33, 1  ;;  %v1177_v38 = vrot.slane %v1176_v34, 1  ;;  %v1190_v39 = vadd.f32 %v1189_v35, %v1188_v31 }
 0x404   :  { %v1186_v40 = vadd.f32 %v1185_v37, %v1184_v33  ;;  %v1193_v41 = vmul.f32 0.125, %v1172_v36  ;;  %v1178_v42 = vadd.f32 %v1177_v38, %v1176_v34  ;;  %v1191_v43 = vrot.slane %v1190_v39, 1 }
 0x406   :  { %v1195_v44 = vmul.f32 0.125, %v1186_v40  ;;  %v1197_v45 = vmul.f32 %v1193_v41, %v1193_v41  ;;  %v1192_v46 = vadd.f32 %v1191_v43, %v1190_v39  ;;  %v1194_v47 = vmul.f32 0.125, %v1178_v42 }
 0x407   :  { %v1201_v54 = vsub.f32 %v1161_v13, %v1193_v41 }
 0x408   :  { %v1199_v48 = vsub.f32 %v1195_v44, %v1197_v45  ;;  %v1196_v49 = vmul.f32 0.125, %v1192_v46  ;;  %v1198_v50 = vmul.f32 %v1194_v47, %v1194_v47  ;;  %v1202_v58 = vsub.f32 %v1164_v18, %v1194_v47  ;;  %v2182_v18 = vld [vmem:[#allocation18] sm:$0xff]  }
 0x40a   :  { %v1203_v51 = vadd.f32 1e-05, %v1199_v48  ;;  %v1200_v52 = vsub.f32 %v1196_v49, %v1198_v50 }
 0x40c   :  { %2194 = vrsqrt.f32 %v1203_v51  ;;  %v1204_v53 = vadd.f32 1e-05, %v1200_v52 }
 0x40e   :  { %2196 = vrsqrt.f32 %v1204_v53 }
 0x416   :  { %v2195_v55 = vpop.eup %2194 }
 0x417   :  { %v1207_v57 = vmul.f32 %v2195_v55, %v1201_v54 }
 0x418   :  { %v2197_v59 = vpop.eup %2196 }
 0x419   :  { %v1216_v60 = vmul.f32 %v1776_v56, %v1207_v57  ;;  %v1208_v62 = vmul.f32 %v2197_v59, %v1202_v58 }
 0x41b   :  { %v1217_v63 = vmul.f32 %v1776_v56, %v1208_v62  ;;  %v1225_v0 = vadd.f32 %v1777_v61, %v1216_v60 }
 0x41d   :  { %v1226_v2 = vadd.f32 %v1777_v61, %v1217_v63  ;;  %v1227_v4 = vmax.f32 %v1225_v0, 0.0 }
 0x41f   :  { %v1228_v6 = vmax.f32 %v1226_v2, 0.0 }
 0x421   :  { %v1229_v1 = vpack.c.bf16 %v1228_v6, %v1227_v4 }
 0x423   :  { %2041 = vmatmul.mubr.bf16.vlgmr.msra.gmra.mrb[16].mxu0 %v1229_v1 }
 0x424   :  { %2080 = vmatprep.mubr.msk.bf16.mxu0 %vm2498_vm0, %v2497_v9  ;;  %2065 = vmatpush3.bf16.msra.mxu0 %v2182_v18 }
 0x425   :  { %2066 = vmatprep.subr.bf16.mxu0 %v2497_v9 }
 0x428   :  { %2067 = vmatpush3.bf16.msra.mxu0 %v2183_v19 }
 0x429   :  { %2068 = vmatprep.subr.bf16.mxu0 %v2497_v9 }
 0x42c   :  { %2069 = vmatpush3.bf16.msra.mxu0 %v2184_v20 }
 0x42d   :  { %2070 = vmatprep.subr.bf16.mxu0 %v2497_v9 }
 0x430   :  { %2071 = vmatpush3.bf16.msra.mxu0 %v2185_v21 }
 0x431   :  { %2072 = vmatprep.subr.bf16.mxu0 %v2497_v9 }
 0x434   :  { %2073 = vmatpush3.bf16.msra.mxu0 %v2186_v22  ;;  %v1798_v22 = vld [vmem:[#allocation20] ss:$0 sm:$0xff] }
 0x435   :  { %2074 = vmatprep.subr.bf16.mxu0 %v2497_v9 }
 0x438   :  { %2075 = vmatpush3.bf16.msra.mxu0 %v2187_v23 }
 0x439   :  { %2076 = vmatprep.subr.bf16.mxu0 %v2497_v9 }
 0x43c   :  { %2077 = vmatpush3.bf16.msra.mxu0 %v2188_v24 }
 0x43d   :  { %2078 = vmatprep.subr.bf16.mxu0 %v2497_v9 }
 0x440   :  { %2079 = vmatpush3.bf16.msra.mxu0 %v2189_v25 }
 0x4f6   :  { %v1335_v8 = vpop.f32.mrb[16].mxu0 }
 0x4f7   :  { %v3199_v10 = vadd.f32 %v1778_v7, %v1335_v8  ;;  %v2042_v11 = vpop.f32.mrb[17].mxu0 }
 0x4f8   :  { %v1338_v12 = vpop.f32.mrb[18].mxu0 }
 0x4f9   :  { %1675 = vst [vmem:[%s3268_s21] sm:$0xff] %v3199_v10  ;;  %v3205_v13 = vadd.f32 %v1778_v7, %v1338_v12  ;;  %v2043_v14 = vpop.f32.mrb[19].mxu0  ;;  %v1643_v17 = vmul.f32 %v3199_v10, %v3199_v10 }
 0x4fa   :  { %v1797_v14 = vld [vmem:[#allocation17] ss:$0 sm:$0xff] }
 0x4fb   :  { %1676 = vst [vmem:[%s3268_s21 + $0x8] sm:$0xff] %v3205_v13  ;;  %v1642_v15 = vmul.f32 %v3205_v13, %v3205_v13  ;;  %v1342_v16 = vpack.c.bf16 %v3205_v13, %v3199_v10 }
 0x4fd   :  { %1644 = vadd.xlane.f32.xlu1 %v1642_v15  ;;  %2061 = vmatmul.mubr.bf16.vlgmr.msra.gmra.mrb[16].mxu1 %v1342_v16 }
 0x501   :  { %1646 = vadd.xlane.f32.xlu1 %v1643_v17 }
 0x5d0   :  { %v1448_v27 = vpop.f32.mrb[16].mxu1 }
 0x5d1   :  { %v1449_v28 = vadd.f32 %v1787_v26, %v1448_v27  ;;  %v2062_v29 = vpop.f32.mrb[17].mxu1 }
 0x5d2   :  { %v1451_v30 = vpop.f32.mrb[18].mxu1 }
 0x5d3   :  { %v1455_v31 = vrot.slane %v1449_v28, 4  ;;  %v1467_v32 = vmul.f32 %v1449_v28, %v1449_v28  ;;  %v1452_v33 = vadd.f32 %v1787_v26, %v1451_v30  ;;  %v2063_v34 = vpop.f32.mrb[19].mxu1 }
 0x5d5   :  { %v1456_v35 = vadd.f32 %v1455_v31, %v1449_v28  ;;  %v1469_v36 = vrot.slane %v1467_v32, 4  ;;  %v1461_v37 = vrot.slane %v1452_v33, 4  ;;  %v1468_v38 = vmul.f32 %v1452_v33, %v1452_v33 }
 0x5d7   :  { %v1457_v39 = vrot.slane %v1456_v35, 2  ;;  %v1470_v40 = vadd.f32 %v1469_v36, %v1467_v32  ;;  %v1462_v41 = vadd.f32 %v1461_v37, %v1452_v33  ;;  %v1475_v42 = vrot.slane %v1468_v38, 4 }
 0x5d9   :  { %v1458_v43 = vadd.f32 %v1457_v39, %v1456_v35  ;;  %v1471_v9 = vrot.slane %v1470_v40, 2  ;;  %v1463_v44 = vrot.slane %v1462_v41, 2  ;;  %v1476_v45 = vadd.f32 %v1475_v42, %v1468_v38 }
 0x5db   :  { %v1459_v46 = vrot.slane %v1458_v43, 1  ;;  %v1472_v47 = vadd.f32 %v1471_v9, %v1470_v40  ;;  %v1464_v48 = vadd.f32 %v1463_v44, %v1462_v41  ;;  %v1477_v49 = vrot.slane %v1476_v45, 2 }
 0x5dd   :  { %v1460_v50 = vadd.f32 %v1459_v46, %v1458_v43  ;;  %v1473_v51 = vrot.slane %v1472_v47, 1  ;;  %v1465_v52 = vrot.slane %v1464_v48, 1  ;;  %v1478_v53 = vadd.f32 %v1477_v49, %v1476_v45 }
 0x5df   :  { %v1474_v54 = vadd.f32 %v1473_v51, %v1472_v47  ;;  %v1481_v55 = vmul.f32 0.125, %v1460_v50  ;;  %v1466_v56 = vadd.f32 %v1465_v52, %v1464_v48  ;;  %v1479_v57 = vrot.slane %v1478_v53, 1 }
 0x5e1   :  { %v1483_v58 = vmul.f32 0.125, %v1474_v54  ;;  %v1485_v59 = vmul.f32 %v1481_v55, %v1481_v55  ;;  %v1480_v60 = vadd.f32 %v1479_v57, %v1478_v53  ;;  %v1482_v61 = vmul.f32 0.125, %v1466_v56 }
 0x5e2   :  { %v1489_v1 = vsub.f32 %v1449_v28, %v1481_v55 }
 0x5e3   :  { %v1487_v62 = vsub.f32 %v1483_v58, %v1485_v59  ;;  %v1484_v63 = vmul.f32 0.125, %v1480_v60  ;;  %v1486_v0 = vmul.f32 %v1482_v61, %v1482_v61  ;;  %v1490_v8 = vsub.f32 %v1452_v33, %v1482_v61  ;;  %v1645_v33 = vpop.xlane.xlu1 %1644 }
 0x5e5   :  { %v1491_v2 = vadd.f32 1e-05, %v1487_v62  ;;  %v1488_v4 = vsub.f32 %v1484_v63, %v1486_v0 }
 0x5e7   :  { %2198 = vrsqrt.f32 %v1491_v2  ;;  %v1492_v6 = vadd.f32 1e-05, %v1488_v4  ;;  %v1647_v37 = vpop.xlane.xlu1 %1646 }
 0x5e9   :  { %2200 = vrsqrt.f32 %v1492_v6 }
 0x5f1   :  { %v2199_v3 = vpop.eup %2198 }
 0x5f2   :  { %v1495_v7 = vmul.f32 %v2199_v3, %v1489_v1 }
 0x5f3   :  { %v2201_v11 = vpop.eup %2200 }
 0x5f4   :  { %v1504_v12 = vmul.f32 %v1796_v5, %v1495_v7  ;;  %v1496_v15 = vmul.f32 %v2201_v11, %v1490_v8 }
 0x5f6   :  { %v1505_v16 = vmul.f32 %v1796_v5, %v1496_v15  ;;  %v1513_v17 = vadd.f32 %v1797_v14, %v1504_v12 }
 0x5f8   :  { %v1514_v18 = vadd.f32 %v1797_v14, %v1505_v16  ;;  %v1515_v19 = vmax.f32 %v1513_v17, 0.0 }
 0x5fa   :  { %v1516_v20 = vmax.f32 %v1514_v18, 0.0 }
 0x5fc   :  { %v1517_v21 = vpack.c.bf16 %v1516_v20, %v1515_v19 }
 0x5fe   :  { %2081 = vmatmul.mubr.bf16.vlgmr.msra.gmra.mrb[20].mxu0 %v1517_v21 }
 0x6d1   :  { %v1623_v23 = vpop.f32.mrb[20].mxu0 }
 0x6d2   :  { %v1624_v24 = vadd.f32 %v1798_v22, %v1623_v23  ;;  %v2082_v25 = vpop.f32.mrb[21].mxu0 }
 0x6d3   :  { %v1626_v26 = vpop.f32.mrb[22].mxu0 }
 0x6d4   :  { %1677 = vst [vmem:[%s3269_s22] sm:$0xff] %v1624_v24  ;;  %v1627_v27 = vadd.f32 %v1798_v22, %v1626_v26  ;;  %v2083_v28 = vpop.f32.mrb[23].mxu0  ;;  %v1636_v29 = vmul.f32 %v1624_v24, %v1624_v24  ;;  %v1630_v32 = vmul.f32 %v1624_v24, %v3205_v13 }
 0x6d6   :  { %1678 = vst [vmem:[%s3269_s22 + $0x8] sm:$0xff] %v1627_v27  ;;  %1638 = vadd.xlane.f32.xlu0 %v1636_v29  ;;  %v1631_v30 = vmul.f32 %v1627_v27, %v3199_v10  ;;  %v1637_v31 = vmul.f32 %v1627_v27, %v1627_v27 }
 0x6d8   :  { %1634 = vadd.xlane.f32.xlu1 %v1631_v30 }
 0x6da   :  { %1640 = vadd.xlane.f32.xlu0 %v1637_v31 }
 0x6de   :  { %1632 = vadd.xlane.f32.xlu0 %v1630_v32 }
 0x763   :  { %v1639_v34 = vpop.xlane.xlu0 %1638 }
 0x764   :  { %v1648_v35 = vmul.f32 %v1645_v33, %v1639_v34 }
 0x765   :  { %v1635_v9 = vpop.xlane.xlu1 %1634 }
 0x766   :  { %v1650_v36 = vmax.f32 %v1648_v35, 1e-16 }
 0x767   :  { %v1641_v38 = vpop.xlane.xlu0 %1640 }
 0x768   :  { %2202 = vrsqrt.f32 %v1650_v36  ;;  %v1649_v39 = vmul.f32 %v1647_v37, %v1641_v38 }
 0x76a   :  { %v1651_v40 = vmax.f32 %v1649_v39, 1e-16 }
 0x76b   :  { %v1633_v42 = vpop.xlane.xlu0 %1632 }
 0x76c   :  { %2204 = vrsqrt.f32 %v1651_v40 }
 0x772   :  { %v2203_v41 = vpop.eup %2202 }
 0x773   :  { %v1654_v43 = vmul.f32 %v2203_v41, %v1633_v42 }
 0x775   :  { %v1657_v45 = vsel %vm1656_vm1, %v1654_v43, 0.0 }
 0x776   :  { %v2205_v10 = vpop.eup %2204 }
 0x777   :  { %v1655_v44 = vmul.f32 %v2205_v10, %v1635_v9 }
 0x779   :  { %v1658_v13 = vsel %vm1656_vm1, %v1655_v44, 0.0 }
 0x77a   :  { %v1659_v46 = vadd.f32 %v1658_v13, %v1657_v45 }
 0x77c   :  { %1660 = vadd.xlane.f32.xlu0 %v1659_v46 }
 0x809   :  { %v1661_v47 = vpop.xlane.xlu0 %1660 }
 0x80a   :  { %v1662_v48 = vrot.slane %v1661_v47, 4 }
 0x80c   :  { %v1663_v49 = vadd.f32 %v1662_v48, %v1661_v47 }
 0x80e   :  { %v1664_v50 = vrot.slane %v1663_v49, 2 }
 0x810   :  { %v1665_v51 = vadd.f32 %v1664_v50, %v1663_v49 }
 0x812   :  { %v1666_v52 = vrot.slane %v1665_v51, 1 }
 0x814   :  { %v1667_v53 = vadd.f32 %v1666_v52, %v1665_v51 }
 0x816   :  { %2084 = vpush %v1667_v53 }
 0x847   :  { %s2085_s22 = spop %2084 }
 0x848   :  { %v1669_v54 = vstv %s2085_s22 }
 0x849   :  { %v1671_v55 = vmul.f32 0.0625, %v1669_v54 }
 0x84b   :  { %v1672_v56 = vsub.f32 0.0, %v1671_v55 }
 0x84d   :  { %1674 = vst.msk [vmem:[#allocation21] sm:$0x1] %vm1673_vm2, %v1672_v56 }
 0x84e   :  { %2459 = shalt.err (!%p2456_p8)
}
 0x84f   :  { %s2460_s15 = scalar_lea.hbm %s3267_s20, 16 }
 0x850   :  { %p2461_p9 = scmp.ne.s32.totalorder %s3267_s20, %s2460_s15  ;;  %p2464_p10 = scmp.lt.u32.totalorder %s2460_s15, %s3267_s20 }
 0x852   :  { %p2466_p11 = pnand %p2464_p10, %p2461_p9 }
 0x854   :  { %2469 = shalt.err (!%p2466_p11)
}
 0x855   :  { %1688 = dma.vmem_to_hbm [thread:$0]  %s1686_s0, 16, %s3267_s20, [#allocation5]  }
 0x856   :  { %2482 = dma.done.wait [#allocation5], 16  }
 0x857   :  { %2483 = vsyncadd [#allocation5], 4294967280 }
 0x858   :  { %1700 = vsyncpa [#allocation4], 1 }
 0x859   :  { %1701 = vsyncpa [#allocation7], 1 }
 0x85a   :  { %1702 = vsyncpa [#allocation10], 1 }
 0x85b   :  { %1703 = vsyncpa [#allocation13], 1 }
 0x85c   :  { %1704 = vsyncpa [#allocation16], 1 }
 0x85d   :  { %1705 = vsyncpa [#allocation19], 1 }
 0x85e   :  { %1706 = vsyncpa [#allocation5], 1 }

</bundles_post_ra>
